<compile_context>
chip_gen: v5e
topology: v5e:2x2
jax: 0.10.0
libtpu: 0.0.40
codegen_flags: <defaults>
</compile_context>

<pallas_src>
import functools

import jax
import jax.numpy as jnp
from jax.experimental import pallas as pl
from jax.experimental.pallas import tpu as pltpu


def _downsample_conv_kernel(ph_ref, w_ref, b_ref, o_ref, slab_ref, *, bt, ho, wo, cin):
    """One grid step = `bt` (batch*time) slices.

    slab[m, t*Cin + c] = phase[kh%2, kw%2][bt, oh + kh//2, ow + kw//2, c],  t = kh*3 + kw
    out = slab @ W + bias, with W[t*Cin + c, :] = conv_weight[:, c, 0, kh, kw].
    """
    m = bt * ho * wo
    # Build the (M, 9*Cin) im2col slab in VMEM: one slice-copy per tap, then a single
    # K = 9*Cin MXU matmul (no per-tap f32 accumulator round-tripping through vregs).
    for kh in range(3):
        p, dh = kh % 2, kh // 2
        for kw in range(3):
            q, dw = kw % 2, kw // 2
            t = kh * 3 + kw
            a = ph_ref[2 * p + q, :, dh:dh + ho, dw:dw + wo, :]      # (bt, ho, wo, Cin) bf16
            slab_ref[:, t * cin:(t + 1) * cin] = a.reshape(m, cin)
    acc = jnp.dot(slab_ref[...], w_ref[...], preferred_element_type=jnp.float32)
    o_ref[...] = (acc + b_ref[...]).astype(o_ref.dtype)


def _pick_bt_block(bt_total, ho, wo, cin, cout, budget_bytes=24 << 20):
    """Largest B*T fold that fits a conservative VMEM budget.

    Prefers leaving >= 2 grid steps (so v7x's two TensorCores both get work); on
    single-TC chips the parallel/arbitrary tag is a measured no-op, so the slightly
    smaller block costs little there.
    """
    def step_bytes(btb):
        phase = 2 * btb * 4 * (ho + 1) * (wo + 1) * cin * 2   # bf16, double-buffered
        out = 2 * btb * ho * wo * cout * 4                    # f32 output block
        slab = btb * ho * wo * 9 * cin * 2                    # im2col scratch
        wts = 2 * (9 * cin * cout * 2 + cout * 4)             # resident weights/bias
        return phase + out + slab + wts

    divs = [d for d in range(1, bt_total + 1)
            if bt_total % d == 0
            and (d == bt_total or (d * ho * wo) % 8 == 0)     # sublane-aligned out block
            and step_bytes(d) <= budget_bytes]
    if not divs:
        divs = [bt_total]
    multi = [d for d in divs if bt_total // d >= 2]
    return max(multi) if multi else max(divs)


@jax.jit
def downsample2d(x, w, b):
    """Conv3d(C, C, kernel_size=(1,3,3), stride=(1,2,2), padding=(0,1,1)).

    x: (B, Cin, T, H, W)  [PyTorch NCDHW layout]
    w: (Cout, Cin, 1, 3, 3)
    b: (Cout,)
    returns (B, Cout, T, Ho, Wo) float32, Ho = (H+1)//2, Wo = (W+1)//2.
    """
    B, Cin, T, H, W = x.shape
    Cout = w.shape[0]
    Ho, Wo = (H + 1) // 2, (W + 1) // 2
    BT = B * T
    Hp, Wp = 2 * (Ho + 1), 2 * (Wo + 1)   # padded extents rounded to even

    # Left pad 1 (the conv's padding); extra right pad only rounds the padded extent
    # up to an even size for the space-to-depth reshape -- those rows/cols are never
    # read by any tap.
    xp = jnp.pad(x, ((0, 0), (0, 0), (0, 0), (1, Hp - 1 - H), (1, Wp - 1 - W)))
    # Space-to-depth phase split fused with the NCDHW -> channels-last transpose:
    #   ph[2p+q, b*T+t, i, j, c] = x_padded[b, c, t, 2i+p, 2j+q]
    xp = xp.reshape(B, Cin, T, Ho + 1, 2, Wo + 1, 2)
    ph = jnp.transpose(xp, (4, 6, 0, 2, 3, 5, 1)).astype(jnp.bfloat16)
    ph = ph.reshape(4, BT, Ho + 1, Wo + 1, Cin)

    # Weight taps stacked along K: row t*Cin + c multiplies tap t = kh*3+kw, channel c.
    wmat = jnp.transpose(w.reshape(Cout, Cin, 3, 3), (2, 3, 1, 0))
    wmat = wmat.reshape(9 * Cin, Cout).astype(jnp.bfloat16)
    b2 = b.reshape(1, Cout).astype(jnp.float32)

    bt_block = _pick_bt_block(BT, Ho, Wo, Cin, Cout)
    grid = (BT // bt_block,)
    m_block = bt_block * Ho * Wo

    # VMEM budget derived from actual block bytes (portable across 64/128 MiB chips).
    phase_block = 4 * bt_block * (Ho + 1) * (Wo + 1) * Cin * 2
    needed = (2 * (phase_block + m_block * Cout * 4 + 9 * Cin * Cout * 2 + Cout * 4)
              + m_block * 9 * Cin * 2)
    vmem_limit = int(min(64 << 20, max(needed + (4 << 20), 16 << 20)))

    flops = 2 * BT * Ho * Wo * 9 * Cin * Cout
    bytes_accessed = (int(ph.size) * 2 + int(wmat.size) * 2 + int(b2.size) * 4
                      + BT * Ho * Wo * Cout * 4)

    # TODO(synk): for very large H*W (e.g. >= 256^2 at C=128) add an output-row tile
    # axis to the grid (overlapping Element-indexed row windows) so phase blocks stay
    # inside v7x's 64 MiB VMEM; not needed at these sizes.
    out = pl.pallas_call(
        functools.partial(_downsample_conv_kernel, bt=bt_block, ho=Ho, wo=Wo, cin=Cin),
        grid=grid,
        in_specs=[
            pl.BlockSpec((4, bt_block, Ho + 1, Wo + 1, Cin), lambda i: (0, i, 0, 0, 0)),
            pl.BlockSpec((9 * Cin, Cout), lambda i: (0, 0)),
            pl.BlockSpec((1, Cout), lambda i: (0, 0)),
        ],
        out_specs=pl.BlockSpec((m_block, Cout), lambda i: (i, 0)),
        out_shape=jax.ShapeDtypeStruct((BT * Ho * Wo, Cout), jnp.float32),
        scratch_shapes=[pltpu.VMEM((m_block, 9 * Cin), jnp.bfloat16)],
        compiler_params=pltpu.CompilerParams(
            dimension_semantics=("parallel",),        # megacore-shard B*T blocks on v7x
            vmem_limit_bytes=vmem_limit,
        ),
        cost_estimate=pl.CostEstimate(
            flops=flops, transcendentals=0, bytes_accessed=int(bytes_accessed)),
    )(ph, wmat, b2)

    out = out.reshape(B, T, Ho, Wo, Cout)
    return jnp.transpose(out, (0, 4, 1, 2, 3))


if __name__ == "__main__":
    key = jax.random.PRNGKey(0)
    kx, kw_, kb = jax.random.split(key, 3)

    # in_channels = 128 keeps the matmul output a full 128-lane tile (unmasked stores).
    B, C, T, H, W = 2, 128, 2, 16, 16
    x = jax.random.normal(kx, (B, C, T, H, W), jnp.float32)
    fan_in = C * 1 * 3 * 3
    w = jax.random.normal(kw_, (C, C, 1, 3, 3), jnp.float32) / jnp.sqrt(float(fan_in))
    b = jax.random.normal(kb, (C,), jnp.float32) * 0.01

    out = jax.block_until_ready(downsample2d(x, w, b))

    # Reference: same bf16-rounded inputs/weights, f32 accumulation, XLA conv.
    xb = x.astype(jnp.bfloat16).astype(jnp.float32)
    wb = w.astype(jnp.bfloat16).astype(jnp.float32)
    ref = jax.lax.conv_general_dilated(
        xb, wb,
        window_strides=(1, 2, 2),
        padding=((0, 0), (1, 1), (1, 1)),
        dimension_numbers=("NCDHW", "OIDHW", "NCDHW"),
        preferred_element_type=jnp.float32,
    ) + b.reshape(1, C, 1, 1, 1)
    ref = jax.block_until_ready(ref)

    assert out.shape == (B, C, T, H // 2, W // 2), out.shape
    assert bool(jnp.all(jnp.isfinite(out)))
    max_err = float(jnp.max(jnp.abs(out - ref)))
    assert max_err < 1e-2, f"max abs error vs reference: {max_err}"
    print("KERNEL_OK")
</pallas_src>

<mosaic_0001>
module attributes {stable_mosaic.version = 11 : i64} {
  func.func @_downsample_conv_kernel(%arg0: i32, %arg1: memref<4x2x9x9x128xbf16, #tpu.memory_space<vmem>>, %arg2: memref<1152x128xbf16, #tpu.memory_space<vmem>>, %arg3: memref<1x128xf32, #tpu.memory_space<vmem>>, %arg4: memref<128x128xf32, #tpu.memory_space<vmem>>, %arg5: memref<128x1152xbf16, #tpu.memory_space<vmem>>) attributes {dimension_semantics = [#tpu.dimension_semantics<parallel>], iteration_bounds = array<i64: 2>, scalar_prefetch = 0 : i64, scratch_operands = 1 : i64, tpu.core_type = #tpu.core_type<tc>, window_params = [{transform_indices = @transform_0, window_bounds = array<i64: 4, 2, 9, 9, 128>}, {pipeline_mode = #tpu.pipeline_mode<synchronous>, transform_indices = @transform_1, window_bounds = array<i64: 1152, 128>}, {pipeline_mode = #tpu.pipeline_mode<synchronous>, transform_indices = @transform_2, window_bounds = array<i64: 1, 128>}, {transform_indices = @transform_3, window_bounds = array<i64: 128, 128>}]} {
    %c0 = arith.constant 0 : index
    %c0_0 = arith.constant 0 : index
    %c0_1 = arith.constant 0 : index
    %c0_2 = arith.constant 0 : index
    %c0_3 = arith.constant 0 : index
    %0 = vector.load %arg1[%c0, %c0_0, %c0_1, %c0_2, %c0_3] : memref<4x2x9x9x128xbf16, #tpu.memory_space<vmem>>, vector<1x2x8x8x128xbf16>
    %1 = vector.shape_cast %0 : vector<1x2x8x8x128xbf16> to vector<2x8x8x128xbf16>
    %2 = vector.shape_cast %1 : vector<2x8x8x128xbf16> to vector<128x128xbf16>
    %c0_4 = arith.constant 0 : index
    %c0_5 = arith.constant 0 : index
    %3 = vector.load %arg5[%c0_4, %c0_5] : memref<128x1152xbf16, #tpu.memory_space<vmem>>, vector<128x128xbf16>
    tpu.vector_store %arg5[%c0_4, %c0_5], %2 {strides = array<i32>} : memref<128x1152xbf16, #tpu.memory_space<vmem>>, vector<128x128xbf16>,
    %c1 = arith.constant 1 : index
    %c0_6 = arith.constant 0 : index
    %c0_7 = arith.constant 0 : index
    %c0_8 = arith.constant 0 : index
    %c0_9 = arith.constant 0 : index
    %4 = vector.load %arg1[%c1, %c0_6, %c0_7, %c0_8, %c0_9] : memref<4x2x9x9x128xbf16, #tpu.memory_space<vmem>>, vector<1x2x8x8x128xbf16>
    %5 = vector.shape_cast %4 : vector<1x2x8x8x128xbf16> to vector<2x8x8x128xbf16>
    %6 = vector.shape_cast %5 : vector<2x8x8x128xbf16> to vector<128x128xbf16>
    %c0_10 = arith.constant 0 : index
    %c128 = arith.constant 128 : index
    %7 = vector.load %arg5[%c0_10, %c128] : memref<128x1152xbf16, #tpu.memory_space<vmem>>, vector<128x128xbf16>
    tpu.vector_store %arg5[%c0_10, %c128], %6 {strides = array<i32>} : memref<128x1152xbf16, #tpu.memory_space<vmem>>, vector<128x128xbf16>,
    %c0_11 = arith.constant 0 : index
    %c0_12 = arith.constant 0 : index
    %c0_13 = arith.constant 0 : index
    %c1_14 = arith.constant 1 : index
    %c0_15 = arith.constant 0 : index
    %8 = vector.load %arg1[%c0_11, %c0_12, %c0_13, %c1_14, %c0_15] : memref<4x2x9x9x128xbf16, #tpu.memory_space<vmem>>, vector<1x2x8x8x128xbf16>
    %9 = vector.shape_cast %8 : vector<1x2x8x8x128xbf16> to vector<2x8x8x128xbf16>
    %10 = vector.shape_cast %9 : vector<2x8x8x128xbf16> to vector<128x128xbf16>
    %c0_16 = arith.constant 0 : index
    %c256 = arith.constant 256 : index
    %11 = vector.load %arg5[%c0_16, %c256] : memref<128x1152xbf16, #tpu.memory_space<vmem>>, vector<128x128xbf16>
    tpu.vector_store %arg5[%c0_16, %c256], %10 {strides = array<i32>} : memref<128x1152xbf16, #tpu.memory_space<vmem>>, vector<128x128xbf16>,
    %c2 = arith.constant 2 : index
    %c0_17 = arith.constant 0 : index
    %c0_18 = arith.constant 0 : index
    %c0_19 = arith.constant 0 : index
    %c0_20 = arith.constant 0 : index
    %12 = vector.load %arg1[%c2, %c0_17, %c0_18, %c0_19, %c0_20] : memref<4x2x9x9x128xbf16, #tpu.memory_space<vmem>>, vector<1x2x8x8x128xbf16>
    %13 = vector.shape_cast %12 : vector<1x2x8x8x128xbf16> to vector<2x8x8x128xbf16>
    %14 = vector.shape_cast %13 : vector<2x8x8x128xbf16> to vector<128x128xbf16>
    %c0_21 = arith.constant 0 : index
    %c384 = arith.constant 384 : index
    %15 = vector.load %arg5[%c0_21, %c384] : memref<128x1152xbf16, #tpu.memory_space<vmem>>, vector<128x128xbf16>
    tpu.vector_store %arg5[%c0_21, %c384], %14 {strides = array<i32>} : memref<128x1152xbf16, #tpu.memory_space<vmem>>, vector<128x128xbf16>,
    %c3 = arith.constant 3 : index
    %c0_22 = arith.constant 0 : index
    %c0_23 = arith.constant 0 : index
    %c0_24 = arith.constant 0 : index
    %c0_25 = arith.constant 0 : index
    %16 = vector.load %arg1[%c3, %c0_22, %c0_23, %c0_24, %c0_25] : memref<4x2x9x9x128xbf16, #tpu.memory_space<vmem>>, vector<1x2x8x8x128xbf16>
    %17 = vector.shape_cast %16 : vector<1x2x8x8x128xbf16> to vector<2x8x8x128xbf16>
    %18 = vector.shape_cast %17 : vector<2x8x8x128xbf16> to vector<128x128xbf16>
    %c0_26 = arith.constant 0 : index
    %c512 = arith.constant 512 : index
    %19 = vector.load %arg5[%c0_26, %c512] : memref<128x1152xbf16, #tpu.memory_space<vmem>>, vector<128x128xbf16>
    tpu.vector_store %arg5[%c0_26, %c512], %18 {strides = array<i32>} : memref<128x1152xbf16, #tpu.memory_space<vmem>>, vector<128x128xbf16>,
    %c2_27 = arith.constant 2 : index
    %c0_28 = arith.constant 0 : index
    %c0_29 = arith.constant 0 : index
    %c1_30 = arith.constant 1 : index
    %c0_31 = arith.constant 0 : index
    %20 = vector.load %arg1[%c2_27, %c0_28, %c0_29, %c1_30, %c0_31] : memref<4x2x9x9x128xbf16, #tpu.memory_space<vmem>>, vector<1x2x8x8x128xbf16>
    %21 = vector.shape_cast %20 : vector<1x2x8x8x128xbf16> to vector<2x8x8x128xbf16>
    %22 = vector.shape_cast %21 : vector<2x8x8x128xbf16> to vector<128x128xbf16>
    %c0_32 = arith.constant 0 : index
    %c640 = arith.constant 640 : index
    %23 = vector.load %arg5[%c0_32, %c640] : memref<128x1152xbf16, #tpu.memory_space<vmem>>, vector<128x128xbf16>
    tpu.vector_store %arg5[%c0_32, %c640], %22 {strides = array<i32>} : memref<128x1152xbf16, #tpu.memory_space<vmem>>, vector<128x128xbf16>,
    %c0_33 = arith.constant 0 : index
    %c0_34 = arith.constant 0 : index
    %c1_35 = arith.constant 1 : index
    %c0_36 = arith.constant 0 : index
    %c0_37 = arith.constant 0 : index
    %24 = vector.load %arg1[%c0_33, %c0_34, %c1_35, %c0_36, %c0_37] : memref<4x2x9x9x128xbf16, #tpu.memory_space<vmem>>, vector<1x2x8x8x128xbf16>
    %25 = vector.shape_cast %24 : vector<1x2x8x8x128xbf16> to vector<2x8x8x128xbf16>
    %26 = vector.shape_cast %25 : vector<2x8x8x128xbf16> to vector<128x128xbf16>
    %c0_38 = arith.constant 0 : index
    %c768 = arith.constant 768 : index
    %27 = vector.load %arg5[%c0_38, %c768] : memref<128x1152xbf16, #tpu.memory_space<vmem>>, vector<128x128xbf16>
    tpu.vector_store %arg5[%c0_38, %c768], %26 {strides = array<i32>} : memref<128x1152xbf16, #tpu.memory_space<vmem>>, vector<128x128xbf16>,
    %c1_39 = arith.constant 1 : index
    %c0_40 = arith.constant 0 : index
    %c1_41 = arith.constant 1 : index
    %c0_42 = arith.constant 0 : index
    %c0_43 = arith.constant 0 : index
    %28 = vector.load %arg1[%c1_39, %c0_40, %c1_41, %c0_42, %c0_43] : memref<4x2x9x9x128xbf16, #tpu.memory_space<vmem>>, vector<1x2x8x8x128xbf16>
    %29 = vector.shape_cast %28 : vector<1x2x8x8x128xbf16> to vector<2x8x8x128xbf16>
    %30 = vector.shape_cast %29 : vector<2x8x8x128xbf16> to vector<128x128xbf16>
    %c0_44 = arith.constant 0 : index
    %c896 = arith.constant 896 : index
    %31 = vector.load %arg5[%c0_44, %c896] : memref<128x1152xbf16, #tpu.memory_space<vmem>>, vector<128x128xbf16>
    tpu.vector_store %arg5[%c0_44, %c896], %30 {strides = array<i32>} : memref<128x1152xbf16, #tpu.memory_space<vmem>>, vector<128x128xbf16>,
    %c0_45 = arith.constant 0 : index
    %c0_46 = arith.constant 0 : index
    %c1_47 = arith.constant 1 : index
    %c1_48 = arith.constant 1 : index
    %c0_49 = arith.constant 0 : index
    %32 = vector.load %arg1[%c0_45, %c0_46, %c1_47, %c1_48, %c0_49] : memref<4x2x9x9x128xbf16, #tpu.memory_space<vmem>>, vector<1x2x8x8x128xbf16>
    %33 = vector.shape_cast %32 : vector<1x2x8x8x128xbf16> to vector<2x8x8x128xbf16>
    %34 = vector.shape_cast %33 : vector<2x8x8x128xbf16> to vector<128x128xbf16>
    %c0_50 = arith.constant 0 : index
    %c1024 = arith.constant 1024 : index
    %35 = vector.load %arg5[%c0_50, %c1024] : memref<128x1152xbf16, #tpu.memory_space<vmem>>, vector<128x128xbf16>
    tpu.vector_store %arg5[%c0_50, %c1024], %34 {strides = array<i32>} : memref<128x1152xbf16, #tpu.memory_space<vmem>>, vector<128x128xbf16>,
    %c0_51 = arith.constant 0 : index
    %c0_52 = arith.constant 0 : index
    %36 = vector.load %arg5[%c0_51, %c0_52] : memref<128x1152xbf16, #tpu.memory_space<vmem>>, vector<128x1152xbf16>
    %c0_53 = arith.constant 0 : index
    %c0_54 = arith.constant 0 : index
    %37 = vector.load %arg2[%c0_53, %c0_54] : memref<1152x128xbf16, #tpu.memory_space<vmem>>, vector<1152x128xbf16>
    %cst = arith.constant dense<0.000000e+00> : vector<128x128xf32>
    %38 = tpu.matmul %36, %37, %cst {dimension_numbers = #tpu.dot_dimension_numbers<[1], [0], [0], [1], [0, 0, 1, 1], [], []>} : vector<128x1152xbf16>, vector<1152x128xbf16>, vector<128x128xf32> -> vector<128x128xf32>
    %c0_55 = arith.constant 0 : index
    %c0_56 = arith.constant 0 : index
    %39 = vector.load %arg3[%c0_55, %c0_56] : memref<1x128xf32, #tpu.memory_space<vmem>>, vector<1x128xf32>
    %40 = vector.broadcast %39 : vector<1x128xf32> to vector<128x128xf32>
    %41 = arith.addf %38, %40 : vector<128x128xf32>
    %c0_57 = arith.constant 0 : index
    %c0_58 = arith.constant 0 : index
    %42 = vector.load %arg4[%c0_57, %c0_58] : memref<128x128xf32, #tpu.memory_space<vmem>>, vector<128x128xf32>
    tpu.vector_store %arg4[%c0_57, %c0_58], %41 {strides = array<i32>} : memref<128x128xf32, #tpu.memory_space<vmem>>, vector<128x128xf32>,
    return
  }
  func.func @transform_0(%arg0: i32) -> (i32, i32, i32, i32, i32) {
    %c0_i32 = arith.constant 0 : i32
    %c0_i32_0 = arith.constant 0 : i32
    %c0_i32_1 = arith.constant 0 : i32
    %c0_i32_2 = arith.constant 0 : i32
    %c0_i32_3 = arith.constant 0 : i32
    return %c0_i32, %arg0, %c0_i32_0, %c0_i32_1, %c0_i32_2 : i32, i32, i32, i32, i32
  }
  func.func @transform_1(%arg0: i32) -> (i32, i32) {
    %c0_i32 = arith.constant 0 : i32
    %c0_i32_0 = arith.constant 0 : i32
    %c0_i32_1 = arith.constant 0 : i32
    return %c0_i32, %c0_i32_0 : i32, i32
  }
  func.func @transform_2(%arg0: i32) -> (i32, i32) {
    %c0_i32 = arith.constant 0 : i32
    %c0_i32_0 = arith.constant 0 : i32
    %c0_i32_1 = arith.constant 0 : i32
    return %c0_i32, %c0_i32_0 : i32, i32
  }
  func.func @transform_3(%arg0: i32) -> (i32, i32) {
    %c0_i32 = arith.constant 0 : i32
    %c0_i32_0 = arith.constant 0 : i32
    return %arg0, %c0_i32 : i32, i32
  }
}

</mosaic_0001>

<bundles_post_ra>
// kernel: downsample2d.1
= control target key start
LH: loop header
LB: loop body
LE: loop exit
PB: predicated region body
PF: predicated region fallthrough
CT: control target
= control target key end

     0   :  { %8 = vsyncpa [#allocation5], 0  ;;  %s5351_s0 = inlined_call_operand.vmem [shape: bf16[4,4,9,9,128], index: 0, kind: input, shape index: {}]   ;;  %s5352_s1 = inlined_call_operand.vmem [shape: bf16[1152,128], index: 1, kind: input, shape index: {}]   ;;  %s5353_s2 = inlined_call_operand.vmem [shape: f32[1,128], index: 2, kind: input, shape index: {}]   ;;  %s5354_s3 = inlined_call_operand.hbm [shape: f32[256,128], index: 3, kind: output, shape index: {}]  }
   0x1   :  { %10 = vsyncpa [#allocation5 + $0x1], 0  ;;  %s4454_s12 = smov 0   ;;  %s4456_s13 = smov 0  }
   0x2   :  { %s4458_s14 = smov 0   ;;  %s4460_s15 = smov 0  }
   0x3 LB: > { %s3420_s16 = sadd.s32 4294967295, %s4430_s15   ;;  %s3421_s17 = sadd.s32 4294967294, %s4430_s15   ;;  %s4430_s15 = sphi %s4460_s15, %s5362_s15   ;;  %s4426_s14 = sphi %s4458_s14, %s5361_s14   ;;  %s4422_s13 = sphi %s4456_s13, %s5360_s13   ;;  %s4418_s12 = sphi %s4454_s12, %s5359_s12  }
   0x4   : > { %s4477_s18 = sadd.s32 1, %s4430_s15   ;;  %s23_s19 = sadd.s32 1, %s4426_s14 }
   0x5   : > { %s20_s20 = ssub.s32 %s4430_s15, %s4477_s18  ;;  %p30_p0 = scmp.ne.s32.totalorder %s4426_s14, %s4422_s13 }
   0x6   : > { %p21_p1 = scmp.eq.s32.totalorder %s20_s20, 0  ;;  %p31_p2 = scmp.eq.s32.totalorder %s4430_s15, 0 }
   0x7   : > { %p102_p3 = scmp.eq.s32.totalorder %s3420_s16, 1  ;;  %p107_p4 = scmp.ne.s32.totalorder %s4422_s13, %s4418_s12 }
   0x8   : > { %s4490_s21 = scalar_select %p21_p1, %s4426_s14, %s23_s19  }
   0x9   : > { %p32_p5 = por %p31_p2, %p30_p0  ;;  %p4492_p6 = por %p102_p3, %p30_p0 }
   0xa   : > { %p108_p7 = scmp.eq.s32.totalorder %s3421_s17, 1  ;;  %p3423_p9 = scmp.ge.s32.totalorder %s4430_s15, 2 }
   0xc   : > { %p4496_p8 = por %p108_p7, %p107_p4  ;;  %130 = sbr.rel (%p3423_p9) target bundleno = 94 (0x5e), region = 24 }
  0x11   : > { %133 = sbr.rel (!%p32_p5) target bundleno = 94 (0x5e), region = 28  ;;  %s135_s24 = sand.u32 (%p32_p5), 1, %s4426_s14  }
  0x12   : > { %s4324_s25 = smul.u32 (%p32_p5), 144, %s4430_s15 }
  0x13   : > { %s4323_s26 = smul.u32 (%p32_p5), 576, %s135_s24 }
  0x14   : > { %s4508_s29 = scalar_lea.vmem (%p32_p5), %s5351_s0, %s4324_s25 }
  0x15   : > { %v158_v0 = vld [vmem:[%s4508_s29] sm:$0xff] (%p32_p5)   ;;  %v162_v1 = vld [vmem:[%s4508_s29 + $0x8] sm:$0xff] (%p32_p5)   ;;  %v166_v2 = vld [vmem:[%s4508_s29 + $0x10] sm:$0xff] (%p32_p5)   ;;  %s4513_s30 = scalar_lea.vmem (%p32_p5), [#allocation3], %s4323_s26 }
  0x16   : > { %159 = vst [vmem:[%s4513_s30] sm:$0xff] %v158_v0   ;;  %v170_v3 = vld [vmem:[%s4508_s29 + $0x18] sm:$0xff]   ;;  %v174_v4 = vld [vmem:[%s4508_s29 + $0x20] sm:$0xff]   ;;  %v178_v5 = vld [vmem:[%s4508_s29 + $0x28] sm:$0xff]  }
  0x17   : > { %163 = vst [vmem:[%s4513_s30 + $0x8] sm:$0xff] %v162_v1   ;;  %v182_v6 = vld [vmem:[%s4508_s29 + $0x30] sm:$0xff]   ;;  %v186_v7 = vld [vmem:[%s4508_s29 + $0x38] sm:$0xff]   ;;  %v190_v8 = vld [vmem:[%s4508_s29 + $0x40] sm:$0xff]  }
  0x18   : > { %167 = vst [vmem:[%s4513_s30 + $0x10] sm:$0xff] %v166_v2   ;;  %v194_v9 = vld [vmem:[%s4508_s29 + $0x48] sm:$0xff]   ;;  %v198_v10 = vld [vmem:[%s4508_s29 + $0x50] sm:$0xff]   ;;  %v202_v11 = vld [vmem:[%s4508_s29 + $0x58] sm:$0xff]  }
  0x19   : > { %171 = vst [vmem:[%s4513_s30 + $0x18] sm:$0xff] %v170_v3   ;;  %v206_v12 = vld [vmem:[%s4508_s29 + $0x60] sm:$0xff]   ;;  %v210_v13 = vld [vmem:[%s4508_s29 + $0x68] sm:$0xff]   ;;  %v214_v14 = vld [vmem:[%s4508_s29 + $0x70] sm:$0xff]  }
  0x1a   : > { %175 = vst [vmem:[%s4513_s30 + $0x20] sm:$0xff] %v174_v4   ;;  %v218_v15 = vld [vmem:[%s4508_s29 + $0x78] sm:$0xff]   ;;  %v222_v16 = vld [vmem:[%s4508_s29 + $0x80] sm:$0xff]   ;;  %v226_v17 = vld [vmem:[%s4508_s29 + $0x88] sm:$0xff]  }
  0x1b   : > { %179 = vst [vmem:[%s4513_s30 + $0x28] sm:$0xff] %v178_v5   ;;  %v230_v18 = vld [vmem:[%s4508_s29 + $0x120] sm:$0xff]   ;;  %v234_v19 = vld [vmem:[%s4508_s29 + $0x128] sm:$0xff]   ;;  %v238_v20 = vld [vmem:[%s4508_s29 + $0x130] sm:$0xff]  }
  0x1c   : > { %183 = vst [vmem:[%s4513_s30 + $0x30] sm:$0xff] %v182_v6   ;;  %v242_v21 = vld [vmem:[%s4508_s29 + $0x138] sm:$0xff]   ;;  %v246_v22 = vld [vmem:[%s4508_s29 + $0x140] sm:$0xff]   ;;  %v250_v23 = vld [vmem:[%s4508_s29 + $0x148] sm:$0xff]  }
  0x1d   : > { %187 = vst [vmem:[%s4513_s30 + $0x38] sm:$0xff] %v186_v7   ;;  %v254_v24 = vld [vmem:[%s4508_s29 + $0x150] sm:$0xff]   ;;  %v258_v25 = vld [vmem:[%s4508_s29 + $0x158] sm:$0xff]   ;;  %v262_v26 = vld [vmem:[%s4508_s29 + $0x160] sm:$0xff]  }
  0x1e   : > { %191 = vst [vmem:[%s4513_s30 + $0x40] sm:$0xff] %v190_v8   ;;  %v266_v27 = vld [vmem:[%s4508_s29 + $0x168] sm:$0xff]   ;;  %v270_v28 = vld [vmem:[%s4508_s29 + $0x170] sm:$0xff]   ;;  %v274_v29 = vld [vmem:[%s4508_s29 + $0x178] sm:$0xff]  }
  0x1f   : > { %195 = vst [vmem:[%s4513_s30 + $0x48] sm:$0xff] %v194_v9   ;;  %v278_v30 = vld [vmem:[%s4508_s29 + $0x180] sm:$0xff]   ;;  %v282_v31 = vld [vmem:[%s4508_s29 + $0x188] sm:$0xff]   ;;  %v286_v32 = vld [vmem:[%s4508_s29 + $0x190] sm:$0xff]  }
  0x20   : > { %199 = vst [vmem:[%s4513_s30 + $0x50] sm:$0xff] %v198_v10   ;;  %v290_v33 = vld [vmem:[%s4508_s29 + $0x198] sm:$0xff]   ;;  %v294_v34 = vld [vmem:[%s4508_s29 + $0x1a0] sm:$0xff]   ;;  %v298_v35 = vld [vmem:[%s4508_s29 + $0x1a8] sm:$0xff]  }
  0x21   : > { %203 = vst [vmem:[%s4513_s30 + $0x58] sm:$0xff] %v202_v11   ;;  %v302_v36 = vld [vmem:[%s4508_s29 + $0x240] sm:$0xff]   ;;  %v306_v37 = vld [vmem:[%s4508_s29 + $0x248] sm:$0xff]   ;;  %v310_v38 = vld [vmem:[%s4508_s29 + $0x250] sm:$0xff]  }
  0x22   : > { %207 = vst [vmem:[%s4513_s30 + $0x60] sm:$0xff] %v206_v12   ;;  %v314_v39 = vld [vmem:[%s4508_s29 + $0x258] sm:$0xff]   ;;  %v318_v40 = vld [vmem:[%s4508_s29 + $0x260] sm:$0xff]   ;;  %v322_v41 = vld [vmem:[%s4508_s29 + $0x268] sm:$0xff]  }
  0x23   : > { %211 = vst [vmem:[%s4513_s30 + $0x68] sm:$0xff] %v210_v13   ;;  %v326_v42 = vld [vmem:[%s4508_s29 + $0x270] sm:$0xff]   ;;  %v330_v43 = vld [vmem:[%s4508_s29 + $0x278] sm:$0xff]   ;;  %v334_v44 = vld [vmem:[%s4508_s29 + $0x280] sm:$0xff]  }
  0x24   : > { %215 = vst [vmem:[%s4513_s30 + $0x70] sm:$0xff] %v214_v14   ;;  %v338_v45 = vld [vmem:[%s4508_s29 + $0x288] sm:$0xff]   ;;  %v342_v46 = vld [vmem:[%s4508_s29 + $0x290] sm:$0xff]   ;;  %v346_v47 = vld [vmem:[%s4508_s29 + $0x298] sm:$0xff]  }
  0x25   : > { %219 = vst [vmem:[%s4513_s30 + $0x78] sm:$0xff] %v218_v15   ;;  %v350_v48 = vld [vmem:[%s4508_s29 + $0x2a0] sm:$0xff]   ;;  %v354_v49 = vld [vmem:[%s4508_s29 + $0x2a8] sm:$0xff]   ;;  %v358_v50 = vld [vmem:[%s4508_s29 + $0x2b0] sm:$0xff]  }
  0x26   : > { %223 = vst [vmem:[%s4513_s30 + $0x80] sm:$0xff] %v222_v16   ;;  %v362_v51 = vld [vmem:[%s4508_s29 + $0x2b8] sm:$0xff]   ;;  %v366_v52 = vld [vmem:[%s4508_s29 + $0x2c0] sm:$0xff]   ;;  %v370_v53 = vld [vmem:[%s4508_s29 + $0x2c8] sm:$0xff]  }
  0x27   : > { %227 = vst [vmem:[%s4513_s30 + $0x88] sm:$0xff] %v226_v17   ;;  %v374_v54 = vld [vmem:[%s4508_s29 + $0x360] sm:$0xff]   ;;  %v378_v55 = vld [vmem:[%s4508_s29 + $0x368] sm:$0xff]   ;;  %v382_v56 = vld [vmem:[%s4508_s29 + $0x370] sm:$0xff]  }
  0x28   : > { %231 = vst [vmem:[%s4513_s30 + $0x90] sm:$0xff] %v230_v18   ;;  %v386_v57 = vld [vmem:[%s4508_s29 + $0x378] sm:$0xff]   ;;  %v390_v58 = vld [vmem:[%s4508_s29 + $0x380] sm:$0xff]   ;;  %v394_v59 = vld [vmem:[%s4508_s29 + $0x388] sm:$0xff]  }
  0x29   : > { %235 = vst [vmem:[%s4513_s30 + $0x98] sm:$0xff] %v234_v19   ;;  %v398_v60 = vld [vmem:[%s4508_s29 + $0x390] sm:$0xff]   ;;  %v402_v61 = vld [vmem:[%s4508_s29 + $0x398] sm:$0xff]   ;;  %v406_v62 = vld [vmem:[%s4508_s29 + $0x3a0] sm:$0xff]  }
  0x2a   : > { %239 = vst [vmem:[%s4513_s30 + $0xa0] sm:$0xff] %v238_v20   ;;  %v410_v63 = vld [vmem:[%s4508_s29 + $0x3a8] sm:$0xff]   ;;  %v414_v0 = vld [vmem:[%s4508_s29 + $0x3b0] sm:$0xff]   ;;  %v418_v1 = vld [vmem:[%s4508_s29 + $0x3b8] sm:$0xff]  }
  0x2b   : > { %243 = vst [vmem:[%s4513_s30 + $0xa8] sm:$0xff] %v242_v21   ;;  %v422_v2 = vld [vmem:[%s4508_s29 + $0x3c0] sm:$0xff]   ;;  %v426_v3 = vld [vmem:[%s4508_s29 + $0x3c8] sm:$0xff]   ;;  %v430_v4 = vld [vmem:[%s4508_s29 + $0x3d0] sm:$0xff]  }
  0x2c   : > { %247 = vst [vmem:[%s4513_s30 + $0xb0] sm:$0xff] %v246_v22   ;;  %v434_v5 = vld [vmem:[%s4508_s29 + $0x3d8] sm:$0xff]   ;;  %v438_v6 = vld [vmem:[%s4508_s29 + $0x3e0] sm:$0xff]   ;;  %v442_v7 = vld [vmem:[%s4508_s29 + $0x3e8] sm:$0xff]  }
  0x2d   : > { %251 = vst [vmem:[%s4513_s30 + $0xb8] sm:$0xff] %v250_v23  }
  0x2e   : > { %255 = vst [vmem:[%s4513_s30 + $0xc0] sm:$0xff] %v254_v24  }
  0x2f   : > { %259 = vst [vmem:[%s4513_s30 + $0xc8] sm:$0xff] %v258_v25  }
  0x30   : > { %263 = vst [vmem:[%s4513_s30 + $0xd0] sm:$0xff] %v262_v26  }
  0x31   : > { %267 = vst [vmem:[%s4513_s30 + $0xd8] sm:$0xff] %v266_v27  }
  0x32   : > { %271 = vst [vmem:[%s4513_s30 + $0xe0] sm:$0xff] %v270_v28  }
  0x33   : > { %275 = vst [vmem:[%s4513_s30 + $0xe8] sm:$0xff] %v274_v29  }
  0x34   : > { %279 = vst [vmem:[%s4513_s30 + $0xf0] sm:$0xff] %v278_v30  }
  0x35   : > { %283 = vst [vmem:[%s4513_s30 + $0xf8] sm:$0xff] %v282_v31  }
  0x36   : > { %287 = vst [vmem:[%s4513_s30 + $0x100] sm:$0xff] %v286_v32  }
  0x37   : > { %291 = vst [vmem:[%s4513_s30 + $0x108] sm:$0xff] %v290_v33  }
  0x38   : > { %295 = vst [vmem:[%s4513_s30 + $0x110] sm:$0xff] %v294_v34  }
  0x39   : > { %299 = vst [vmem:[%s4513_s30 + $0x118] sm:$0xff] %v298_v35  }
  0x3a   : > { %303 = vst [vmem:[%s4513_s30 + $0x120] sm:$0xff] %v302_v36  }
  0x3b   : > { %307 = vst [vmem:[%s4513_s30 + $0x128] sm:$0xff] %v306_v37  }
  0x3c   : > { %311 = vst [vmem:[%s4513_s30 + $0x130] sm:$0xff] %v310_v38  }
  0x3d   : > { %315 = vst [vmem:[%s4513_s30 + $0x138] sm:$0xff] %v314_v39  }
  0x3e   : > { %319 = vst [vmem:[%s4513_s30 + $0x140] sm:$0xff] %v318_v40  }
  0x3f   : > { %323 = vst [vmem:[%s4513_s30 + $0x148] sm:$0xff] %v322_v41  }
  0x40   : > { %327 = vst [vmem:[%s4513_s30 + $0x150] sm:$0xff] %v326_v42  }
  0x41   : > { %331 = vst [vmem:[%s4513_s30 + $0x158] sm:$0xff] %v330_v43  }
  0x42   : > { %335 = vst [vmem:[%s4513_s30 + $0x160] sm:$0xff] %v334_v44  }
  0x43   : > { %339 = vst [vmem:[%s4513_s30 + $0x168] sm:$0xff] %v338_v45  }
  0x44   : > { %343 = vst [vmem:[%s4513_s30 + $0x170] sm:$0xff] %v342_v46  }
  0x45   : > { %347 = vst [vmem:[%s4513_s30 + $0x178] sm:$0xff] %v346_v47  }
  0x46   : > { %351 = vst [vmem:[%s4513_s30 + $0x180] sm:$0xff] %v350_v48  }
  0x47   : > { %355 = vst [vmem:[%s4513_s30 + $0x188] sm:$0xff] %v354_v49  }
  0x48   : > { %359 = vst [vmem:[%s4513_s30 + $0x190] sm:$0xff] %v358_v50  }
  0x49   : > { %363 = vst [vmem:[%s4513_s30 + $0x198] sm:$0xff] %v362_v51  }
  0x4a   : > { %367 = vst [vmem:[%s4513_s30 + $0x1a0] sm:$0xff] %v366_v52  }
  0x4b   : > { %371 = vst [vmem:[%s4513_s30 + $0x1a8] sm:$0xff] %v370_v53  }
  0x4c   : > { %375 = vst [vmem:[%s4513_s30 + $0x1b0] sm:$0xff] %v374_v54  }
  0x4d   : > { %379 = vst [vmem:[%s4513_s30 + $0x1b8] sm:$0xff] %v378_v55  }
  0x4e   : > { %383 = vst [vmem:[%s4513_s30 + $0x1c0] sm:$0xff] %v382_v56  }
  0x4f   : > { %387 = vst [vmem:[%s4513_s30 + $0x1c8] sm:$0xff] %v386_v57  }
  0x50   : > { %391 = vst [vmem:[%s4513_s30 + $0x1d0] sm:$0xff] %v390_v58  }
  0x51   : > { %395 = vst [vmem:[%s4513_s30 + $0x1d8] sm:$0xff] %v394_v59  }
  0x52   : > { %399 = vst [vmem:[%s4513_s30 + $0x1e0] sm:$0xff] %v398_v60  }
  0x53   : > { %403 = vst [vmem:[%s4513_s30 + $0x1e8] sm:$0xff] %v402_v61  }
  0x54   : > { %407 = vst [vmem:[%s4513_s30 + $0x1f0] sm:$0xff] %v406_v62  }
  0x55   : > { %411 = vst [vmem:[%s4513_s30 + $0x1f8] sm:$0xff] %v410_v63  }
  0x56   : > { %415 = vst [vmem:[%s4513_s30 + $0x200] sm:$0xff] %v414_v0  }
  0x57   : > { %419 = vst [vmem:[%s4513_s30 + $0x208] sm:$0xff] %v418_v1  }
  0x58   : > { %423 = vst [vmem:[%s4513_s30 + $0x210] sm:$0xff] %v422_v2  }
  0x59   : > { %427 = vst [vmem:[%s4513_s30 + $0x218] sm:$0xff] %v426_v3  }
  0x5a   : > { %431 = vst [vmem:[%s4513_s30 + $0x220] sm:$0xff] %v430_v4  }
  0x5b   : > { %435 = vst [vmem:[%s4513_s30 + $0x228] sm:$0xff] %v434_v5  }
  0x5c   : > { %439 = vst [vmem:[%s4513_s30 + $0x230] sm:$0xff] %v438_v6  }
  0x5d   : > { %443 = vst [vmem:[%s4513_s30 + $0x238] sm:$0xff] %v442_v7  }
  0x5e PF: > { %p3427_p10 = scmp.ge.s32.totalorder %s4430_s15, 1  ;;  %p756_p11 = scmp.lt.s32.totalorder %s4430_s15, 3 }
  0x60   : > { %p757_p12 = pnand %p3427_p10, %p756_p11 }
  0x61   : > { %s4662_s6 = sand.u32 (!%p757_p12), 1, %s4422_s13   ;;  %s4298_s9 = sshll.u32 (!%p757_p12), %s3420_s16, 7 }
  0x62   : > { %760 = sbr.rel (%p757_p12) target bundleno = 557 (0x22d), region = 69  ;;  %s3349_s19 = scalar_lea.hbm (!%p757_p12), %s5354_s3, %s4298_s9 }
  0x63   : > { %s4325_s7 = smul.u32 (!%p757_p12), 576, %s4662_s6  ;;  %s3352_s24 = sshll.u32 (!%p757_p12), %s3349_s19, 4  ;;  %s3353_s24 = int_to_ptr.hbm [resolvable:$true] %s3352_s24 }
  0x64   : > { %s3338_s16 = scalar_lea.sflag (!%p757_p12), [#allocation5], %s4662_s6  ;;  %s4382_s25 = sshra.s32 (!%p757_p12), %s3353_s24, 4  ;;  %s4383_s25 = int_to_ptr.hbm [resolvable:$true] %s4382_s25 }
  0x65   : > { %s4668_s10 = scalar_lea.vmem (!%p757_p12), [#allocation3], %s4325_s7  ;;  %s4384_s26 = scalar_lea.hbm (!%p757_p12), %s4383_s25, 128 }
  0x66   : > { %p4385_p13 = scmp.ne.s32.totalorder (!%p757_p12), %s4383_s25, %s4384_s26  ;;  %s4388_s29 = scalar_lea.hbm (!%p757_p12), %s5354_s3, 256 }
  0x67   : > { %v4233_v8 = vld [vmem:[%s5352_s1 + $0x38] sm:$0xff]  ;;  %v4232_v9 = vld [vmem:[%s5352_s1 + $0x30] sm:$0xff]  ;;  %v792_v10 = vld [vmem:[%s4668_s10 + $0x20] sm:$0xf]  ;;  %vm885_vm0 = vsmask.f32 3328  ;;  %p4389_p2 = scmp.lt.s32.totalorder %s4383_s25, %s5354_s3  ;;  %p4390_p3 = scmp.lt.s32.totalorder %s4388_s29, %s4384_s26 }
  0x68   : > { %4299 = vmatpush.bf16.msra.mxu1 %v4233_v8  ;;  %4300 = vmatpush.bf16.msra.mxu2 %v4233_v8  ;;  %v793_v11 = vld [vmem:[%s4668_s10 + $0x28] sm:$0xf]  ;;  %808 = vst [vmem:[#allocation2 + $0x90] sm:$0xf] %v792_v10  ;;  %v797_v13 = vld [vmem:[%s4668_s10 + $0x50] sm:$0xf]  ;;  %p4386_p0 = pnand %p4385_p13, %p4492_p6 }
  0x69   : > { %4301 = vmatpush.bf16.msra.mxu3 %v4233_v8  ;;  %2880 = vmatpush.bf16.msra.mxu0 %v4233_v8  ;;  %v796_v12 = vld [vmem:[%s4668_s10 + $0x48] sm:$0xf]  ;;  %809 = vst [vmem:[#allocation2 + $0xb4] sm:$0xf] %v793_v11  ;;  %v801_v16 = vld [vmem:[%s4668_s10 + $0x70] sm:$0xf]  ;;  %p4391_p4 = por %p4390_p3, %p4389_p2 }
  0x6a   : > { %v4231_v14 = vld [vmem:[%s5352_s1 + $0x28] sm:$0xff]  ;;  %812 = vst [vmem:[#allocation2 + $0x120] sm:$0xf] %v796_v12  ;;  %v788_v17 = vld [vmem:[%s4668_s10] sm:$0xf]  ;;  %v4229_v24 = vld [vmem:[%s5352_s1 + $0x18] sm:$0xff]  ;;  %p4387_p1 = pneg %p4386_p0 }
  0x6b   : > { %v800_v15 = vld [vmem:[%s4668_s10 + $0x68] sm:$0xf]  ;;  %813 = vst [vmem:[#allocation2 + $0x144] sm:$0xf] %v797_v13  ;;  %v4230_v19 = vld [vmem:[%s5352_s1 + $0x20] sm:$0xff]  ;;  %v4228_v28 = vld [vmem:[%s5352_s1 + $0x10] sm:$0xff] }
  0x6c   : > { %4302 = vmatpush.bf16.msra.mxu1 %v4232_v9  ;;  %4303 = vmatpush.bf16.msra.mxu2 %v4232_v9  ;;  %816 = vst [vmem:[#allocation2 + $0x1b0] sm:$0xf] %v800_v15  ;;  %v789_v18 = vld [vmem:[%s4668_s10 + $0x8] sm:$0xf]  ;;  %v794_v20 = vld [vmem:[%s4668_s10 + $0x30] sm:$0xf]  ;;  %p4392_p5 = pnand %p4391_p4, %p4387_p1 }
  0x6d   : > { %4304 = vmatpush.bf16.msra.mxu3 %v4232_v9  ;;  %2881 = vmatpush.bf16.msra.mxu0 %v4232_v9  ;;  %817 = vst [vmem:[#allocation2 + $0x1d4] sm:$0xf] %v801_v16  ;;  %v795_v21 = vld [vmem:[%s4668_s10 + $0x38] sm:$0xf]  ;;  %v799_v23 = vld [vmem:[%s4668_s10 + $0x60] sm:$0xf] }
  0x6e   : > { %804 = vst [vmem:[#allocation2] sm:$0xf] %v788_v17  ;;  %v798_v22 = vld [vmem:[%s4668_s10 + $0x58] sm:$0xf]  ;;  %v803_v26 = vld [vmem:[%s4668_s10 + $0x80] sm:$0xf] }
  0x6f   : > { %805 = vst [vmem:[#allocation2 + $0x24] sm:$0xf] %v789_v18  ;;  %v802_v25 = vld [vmem:[%s4668_s10 + $0x78] sm:$0xf]  ;;  %v790_v27 = vld [vmem:[%s4668_s10 + $0x10] sm:$0xf] }
  0x70   : > { %4305 = vmatpush.bf16.msra.mxu1 %v4231_v14  ;;  %4306 = vmatpush.bf16.msra.mxu2 %v4231_v14  ;;  %810 = vst [vmem:[#allocation2 + $0xd8] sm:$0xf] %v794_v20  ;;  %v791_v29 = vld [vmem:[%s4668_s10 + $0x18] sm:$0xf]  ;;  %v4227_v30 = vld [vmem:[%s5352_s1 + $0x8] sm:$0xff]  ;;  %v4226_v34 = vld [vmem:[%s5352_s1] sm:$0xff] }
  0x71   : > { %4307 = vmatpush.bf16.msra.mxu3 %v4231_v14  ;;  %2882 = vmatpush.bf16.msra.mxu0 %v4231_v14  ;;  %811 = vst [vmem:[#allocation2 + $0xfc] sm:$0xf] %v795_v21  ;;  %v853_v31 = vld [vmem:[%s4668_s10] sm:$0xf]  ;;  %v3647_v32 = vld [vmem:[#allocation2 + $0x90] sm:$0xf] }
  0x72   : > { %814 = vst [vmem:[#allocation2 + $0x168] sm:$0xf] %v798_v22  ;;  %v4176_v33 = vld [vmem:[#allocation2 + $0xb0] sm:$0xf0]  ;;  %v3719_v35 = vld [vmem:[#allocation2 + $0x120] sm:$0xf] }
  0x73   : > { %815 = vst [vmem:[#allocation2 + $0x18c] sm:$0xf] %v799_v23  ;;  %v4194_v36 = vld [vmem:[#allocation2 + $0x140] sm:$0xf0]  ;;  %v889_v37 = vshrl.u32 %v853_v31, 16  ;;  %v892_v38 = vshll.u32 %v853_v31, 16  ;;  %v3648_v48 = vor.u32 %v4176_v33, %v3647_v32 }
  0x74   : > { %4308 = vmatpush.bf16.msra.mxu1 %v4230_v19  ;;  %4309 = vmatpush.bf16.msra.mxu2 %v4230_v19  ;;  %818 = vst [vmem:[#allocation2 + $0x1f8] sm:$0xf] %v802_v25  ;;  %v3791_v39 = vld [vmem:[#allocation2 + $0x1b0] sm:$0xf]  ;;  %v4212_v40 = vld [vmem:[#allocation2 + $0x1d0] sm:$0xf0]  ;;  %v3720_v50 = vor.u32 %v4194_v36, %v3719_v35 }
  0x75   : > { %4310 = vmatpush.bf16.msra.mxu3 %v4230_v19  ;;  %2883 = vmatpush.bf16.msra.mxu0 %v4230_v19  ;;  %819 = vst [vmem:[#allocation2 + $0x21c] sm:$0xf] %v803_v26  ;;  %v3575_v41 = vld [vmem:[#allocation2] sm:$0xf]  ;;  %v3429_v42 = vld [vmem:[%s4668_s10 + $0x90] sm:$0xf]  ;;  %v3792_v60 = vor.u32 %v4212_v40, %v3791_v39 }
  0x76   : > { %806 = vst [vmem:[#allocation2 + $0x48] sm:$0xf] %v790_v27  ;;  %v3430_v43 = vld [vmem:[%s4668_s10 + $0x98] sm:$0xf]  ;;  %v854_v46 = vld [vmem:[%s4668_s10 + $0x4] sm:$0x1] }
  0x77   : > { %807 = vst [vmem:[#allocation2 + $0x6c] sm:$0xf] %v791_v29  ;;  %v4249_v44 = vld [vmem:[%s5352_s1 + $0xb8] sm:$0xff]  ;;  %v855_v47 = vld [vmem:[%s4668_s10 + $0x8] sm:$0xf]  ;;  %v891_v52 = vrot.slane %v889_v37, 4 }
  0x78   : > { %4311 = vmatpush.bf16.msra.mxu1 %v4229_v24  ;;  %4312 = vmatpush.bf16.msra.mxu2 %v4229_v24  ;;  %v4241_v45 = vld [vmem:[%s5352_s1 + $0x78] sm:$0xff]  ;;  %837 = vst [vmem:[#allocation2 + $0x4] sm:$0xf] %v3429_v42  ;;  %v4158_v49 = vld [vmem:[#allocation2 + $0x20] sm:$0xf0]  ;;  %v894_v53 = vrot.slane %v892_v38, 5 }
  0x79   : > { %4313 = vmatpush.bf16.msra.mxu3 %v4229_v24  ;;  %2884 = vmatpush.bf16.msra.mxu0 %v4229_v24  ;;  %838 = vst [vmem:[#allocation2 + $0x28] sm:$0xf] %v3430_v43  ;;  %v856_v51 = vld [vmem:[%s4668_s10 + $0xc] sm:$0x1]  ;;  %vm886_vm1 = vsmask.f32 7440  ;;  %v3576_v61 = vor.u32 %v4158_v49, %v3575_v41 }
  0x7a   : > { %v4257_v54 = vld [vmem:[%s5352_s1 + $0xf8] sm:$0xff]  ;;  %v898_v55 = vshll.u32 %v854_v46, 16  ;;  %v903_v56 = vshrl.u32 %v855_v47, 16  ;;  %v906_v57 = vshll.u32 %v855_v47, 16  ;;  %v912_v58 = vshll.u32 %v856_v51, 16  ;;  %v4248_v2 = vld [vmem:[%s5352_s1 + $0xb0] sm:$0xff]  ;;  %vm4730_vm2 = vmor %vm885_vm0, %vm886_vm1 }
  0x7b   : > { %v3445_v59 = vld [vmem:[%s4668_s10 + $0x120] sm:$0xf]  ;;  %v895_v62 = vor.u32 %v894_v53, %v891_v52  ;;  %v3446_v63 = vld [vmem:[%s4668_s10 + $0x128] sm:$0xf]  ;;  %v3461_v0 = vld [vmem:[%s4668_s10 + $0x1b0] sm:$0xf] }
  0x7c   : > { %4314 = vmatpush.bf16.msra.mxu1 %v4228_v28  ;;  %4315 = vmatpush.bf16.msra.mxu2 %v4228_v28  ;;  %1161 = vst [vmem:[#allocation2 + $0xc] sm:$0xf] %v3445_v59  ;;  %v4265_v1 = vld [vmem:[%s5352_s1 + $0x138] sm:$0xff]  ;;  %v900_v4 = vrot.slane %v898_v55, 5  ;;  %v905_v5 = vrot.slane %v903_v56, 4  ;;  %v908_v6 = vrot.slane %v906_v57, 5 }
  0x7d   : > { %4316 = vmatpush.bf16.msra.mxu3 %v4228_v28  ;;  %2885 = vmatpush.bf16.msra.mxu0 %v4228_v28  ;;  %v4240_v7 = vld [vmem:[%s5352_s1 + $0x70] sm:$0xff]  ;;  %v896_v8 = vrot.slane %v895_v62, 4  ;;  %1162 = vst [vmem:[#allocation2 + $0x30] sm:$0xf] %v3446_v63  ;;  %v3462_v9 = vld [vmem:[%s4668_s10 + $0x1b8] sm:$0xf] }
  0x7e   : > { %v909_v10 = vor.u32 %v908_v6, %v905_v5  ;;  %v914_v11 = vrot.slane %v912_v58, 5  ;;  %1194 = vst [vmem:[#allocation2 + $0x10] sm:$0xf] %v3461_v0  ;;  %v857_v12 = vld [vmem:[%s4668_s10 + $0x10] sm:$0xf]  ;;  %v4247_v16 = vld [vmem:[%s5352_s1 + $0xa8] sm:$0xff] }
  0x7f   : > { %v4256_v13 = vld [vmem:[%s5352_s1 + $0xf0] sm:$0xff]  ;;  %v901_v15 = vsel %vm4730_vm2, %v896_v8, %v900_v4  ;;  %1195 = vst [vmem:[#allocation2 + $0x34] sm:$0xf] %v3462_v9  ;;  %v4239_v17 = vld [vmem:[%s5352_s1 + $0x68] sm:$0xff]  ;;  %v917_v19 = vshrl.u32 %v857_v12, 16  ;;  %v920_v28 = vshll.u32 %v857_v12, 16 }
  0x80   : > { %4317 = vmatpush.bf16.msra.mxu1 %v4227_v30  ;;  %4318 = vmatpush.bf16.msra.mxu2 %v4227_v30  ;;  %v4264_v14 = vld [vmem:[%s5352_s1 + $0x130] sm:$0xff]  ;;  %v910_v18 = vrot.slane %v909_v10, 4  ;;  %1128 = vst [vmem:[#allocation2 + $0x8] sm:$0xf] %v901_v15  ;;  %v3431_v20 = vld [vmem:[%s4668_s10 + $0xa0] sm:$0xf] }
  0x81   : > { %4319 = vmatpush.bf16.msra.mxu3 %v4227_v30  ;;  %2886 = vmatpush.bf16.msra.mxu0 %v4227_v30  ;;  %v3432_v21 = vld [vmem:[%s4668_s10 + $0xa8] sm:$0xf]  ;;  %v858_v22 = vld [vmem:[%s4668_s10 + $0x14] sm:$0x1]  ;;  %839 = vst [vmem:[#allocation2 + $0x4c] sm:$0xf] %v3431_v20 }
  0x82   : > { %v4255_v23 = vld [vmem:[%s5352_s1 + $0xe8] sm:$0xff]  ;;  %v915_v24 = vsel %vm4730_vm2, %v910_v18, %v914_v11  ;;  %v859_v25 = vld [vmem:[%s4668_s10 + $0x18] sm:$0xf]  ;;  %v860_v26 = vld [vmem:[%s4668_s10 + $0x1c] sm:$0x1]  ;;  %v919_v27 = vrot.slane %v917_v19, 4 }
  0x83   : > { %1129 = vst [vmem:[#allocation2 + $0x2c] sm:$0xf] %v915_v24  ;;  %v4263_v29 = vld [vmem:[%s5352_s1 + $0x128] sm:$0xff]  ;;  %v4246_v30 = vld [vmem:[%s5352_s1 + $0xa0] sm:$0xff]  ;;  %v926_v31 = vshll.u32 %v858_v22, 16  ;;  %v931_v32 = vshrl.u32 %v859_v25, 16 }
  0x84   : > { %4320 = vmatpush.bf16.msra.mxu1 %v4226_v34  ;;  %4321 = vmatpush.bf16.msra.mxu2 %v4226_v34  ;;  %840 = vst [vmem:[#allocation2 + $0x70] sm:$0xf] %v3432_v21  ;;  %v4238_v33 = vld [vmem:[%s5352_s1 + $0x60] sm:$0xff]  ;;  %v4185_v35 = vld [vmem:[#allocation2 + $0xf8] sm:$0xf0]  ;;  %v922_v38 = vrot.slane %v920_v28, 5 }
  0x85   : > { %4322 = vmatpush.bf16.msra.mxu3 %v4226_v34  ;;  %2887 = vmatpush.bf16.msra.mxu0 %v4226_v34  ;;  %v3683_v34 = vld [vmem:[#allocation2 + $0xd8] sm:$0xf]  ;;  %v3755_v36 = vld [vmem:[#allocation2 + $0x168] sm:$0xf]  ;;  %v4203_v37 = vld [vmem:[#allocation2 + $0x188] sm:$0xf0] }
  0x86   : > { %v934_v39 = vshll.u32 %v859_v25, 16  ;;  %v940_v40 = vshll.u32 %v860_v26, 16  ;;  %v4254_v41 = vld [vmem:[%s5352_s1 + $0xe0] sm:$0xff]  ;;  %v3827_v43 = vld [vmem:[#allocation2 + $0x1f8] sm:$0xf]  ;;  %v933_v46 = vrot.slane %v931_v32, 4  ;;  %v923_v49 = vor.u32 %v922_v38, %v919_v27 }
  0x87   : > { %2898 = vmatmul.bf16.vlgmr.msra.gmra.mxu1 %v3648_v48  ;;  %2908 = vmatmul.bf16.vlgmr.msra.gmra.mxu2 %v3720_v50  ;;  %v4262_v42 = vld [vmem:[%s5352_s1 + $0x120] sm:$0xff]  ;;  %v3447_v47 = vld [vmem:[%s4668_s10 + $0x130] sm:$0xf]  ;;  %v4167_v48 = vld [vmem:[#allocation2 + $0x68] sm:$0xf0]  ;;  %v928_v50 = vrot.slane %v926_v31, 5 }
  0x88   : > { %2978 = vmatpush.bf16.msrb.mxu2 %v4249_v44  ;;  %2929 = vmatpush.bf16.msrb.mxu1 %v4241_v45  ;;  %v4221_v44 = vld [vmem:[#allocation2 + $0x218] sm:$0xf0]  ;;  %v3611_v45 = vld [vmem:[#allocation2 + $0x48] sm:$0xf]  ;;  %v936_v51 = vrot.slane %v934_v39, 5  ;;  %v924_v57 = vrot.slane %v923_v49, 4 }
  0x89   : > { %2918 = vmatmul.bf16.vlgmr.msra.gmra.mxu3 %v3792_v60  ;;  %2888 = vmatmul.bf16.vlgmr.msra.gmra.mxu0 %v3576_v61  ;;  %v3448_v52 = vld [vmem:[%s4668_s10 + $0x138] sm:$0xf]  ;;  %1163 = vst [vmem:[#allocation2 + $0x54] sm:$0xf] %v3447_v47  ;;  %v3463_v53 = vld [vmem:[%s4668_s10 + $0x1c0] sm:$0xf]  ;;  %v3684_v60 = vor.u32 %v4185_v35, %v3683_v34  ;;  %v3756_v61 = vor.u32 %v4203_v37, %v3755_v36 }
  0x8a   : > { %3027 = vmatpush.bf16.msrb.mxu3 %v4257_v54  ;;  %3076 = vmatpush.bf16.msrb.mxu0 %v4265_v1  ;;  %v3464_v54 = vld [vmem:[%s4668_s10 + $0x1c8] sm:$0xf]  ;;  %v4245_v55 = vld [vmem:[%s5352_s1 + $0x98] sm:$0xff]  ;;  %v937_v58 = vor.u32 %v936_v51, %v933_v46  ;;  %v942_v59 = vrot.slane %v940_v40, 5  ;;  %1164 = vst [vmem:[#allocation2 + $0x78] sm:$0xf] %v3448_v52  ;;  %v3828_v62 = vor.u32 %v4221_v44, %v3827_v43 }
  0x8b   : > { %v4237_v56 = vld [vmem:[%s5352_s1 + $0x58] sm:$0xff]  ;;  %1196 = vst [vmem:[#allocation2 + $0x58] sm:$0xf] %v3463_v53  ;;  %v3612_v0 = vor.u32 %v4167_v48, %v3611_v45  ;;  %v861_v5 = vld [vmem:[%s4668_s10 + $0x20] sm:$0xf]  ;;  %v4236_v8 = vld [vmem:[%s5352_s1 + $0x50] sm:$0xff] }
  0x8c   : > { %2979 = vmatpush.bf16.msrb.mxu2 %v4248_v2  ;;  %2930 = vmatpush.bf16.msrb.mxu1 %v4240_v7  ;;  %v4253_v63 = vld [vmem:[%s5352_s1 + $0xd8] sm:$0xff]  ;;  %v929_v2 = vsel %vm4730_vm2, %v924_v57, %v928_v50  ;;  %v938_v4 = vrot.slane %v937_v58, 4  ;;  %1197 = vst [vmem:[#allocation2 + $0x7c] sm:$0xf] %v3464_v54  ;;  %v863_v6 = vld [vmem:[%s4668_s10 + $0x28] sm:$0xf] }
  0x8d   : > { %v4261_v1 = vld [vmem:[%s5352_s1 + $0x118] sm:$0xff]  ;;  %1130 = vst [vmem:[#allocation2 + $0x50] sm:$0xf] %v929_v2  ;;  %v4244_v7 = vld [vmem:[%s5352_s1 + $0x90] sm:$0xff]  ;;  %v945_v10 = vshrl.u32 %v861_v5, 16  ;;  %v948_v11 = vshll.u32 %v861_v5, 16 }
  0x8e   : > { %3028 = vmatpush.bf16.msrb.mxu3 %v4256_v13  ;;  %3077 = vmatpush.bf16.msrb.mxu0 %v4264_v14  ;;  %v943_v9 = vsel %vm4730_vm2, %v938_v4, %v942_v59  ;;  %v959_v12 = vshrl.u32 %v863_v6, 16  ;;  %v962_v13 = vshll.u32 %v863_v6, 16  ;;  %v4243_v18 = vld [vmem:[%s5352_s1 + $0x88] sm:$0xff]  ;;  %v3433_v22 = vld [vmem:[%s4668_s10 + $0xb0] sm:$0xf]  ;;  %v4281_v32 = vld [vmem:[%s5352_s1 + $0x1b8] sm:$0xff] }
  0x8f   : > { %1131 = vst [vmem:[#allocation2 + $0x74] sm:$0xf] %v943_v9  ;;  %v947_v14 = vrot.slane %v945_v10, 4  ;;  %v950_v15 = vrot.slane %v948_v11, 5  ;;  %v4235_v21 = vld [vmem:[%s5352_s1 + $0x48] sm:$0xff]  ;;  %v4250_v43 = vld [vmem:[%s5352_s1 + $0xc0] sm:$0xff] }
  0x90   : > { %2980 = vmatpush.bf16.msrb.mxu2 %v4247_v16  ;;  %2931 = vmatpush.bf16.msrb.mxu1 %v4239_v17  ;;  %v4252_v16 = vld [vmem:[%s5352_s1 + $0xd0] sm:$0xff]  ;;  %v961_v19 = vrot.slane %v959_v12, 4  ;;  %v964_v20 = vrot.slane %v962_v13, 5  ;;  %v4251_v25 = vld [vmem:[%s5352_s1 + $0xc8] sm:$0xff]  ;;  %841 = vst [vmem:[#allocation2 + $0x94] sm:$0xf] %v3433_v22 }
  0x91   : > { %v4260_v17 = vld [vmem:[%s5352_s1 + $0x110] sm:$0xff]  ;;  %v951_v24 = vor.u32 %v950_v15, %v947_v14  ;;  %v4259_v26 = vld [vmem:[%s5352_s1 + $0x108] sm:$0xff]  ;;  %v862_v27 = vld [vmem:[%s4668_s10 + $0x24] sm:$0x1] }
  0x92   : > { %3029 = vmatpush.bf16.msrb.mxu3 %v4255_v23  ;;  %3078 = vmatpush.bf16.msrb.mxu0 %v4263_v29  ;;  %v3434_v23 = vld [vmem:[%s4668_s10 + $0xb8] sm:$0xf]  ;;  %v965_v28 = vor.u32 %v964_v20, %v961_v19  ;;  %v4242_v29 = vld [vmem:[%s5352_s1 + $0x80] sm:$0xff]  ;;  %v864_v31 = vld [vmem:[%s4668_s10 + $0x2c] sm:$0x1]  ;;  %v954_v35 = vshll.u32 %v862_v27, 16 }
  0x93   : > { %842 = vst [vmem:[#allocation2 + $0xb8] sm:$0xf] %v3434_v23  ;;  %v952_v34 = vrot.slane %v951_v24, 4  ;;  %v968_v37 = vshll.u32 %v864_v31, 16  ;;  %v3449_v38 = vld [vmem:[%s4668_s10 + $0x140] sm:$0xf] }
  0x94   : > { %2981 = vmatpush.bf16.msrb.mxu2 %v4246_v30  ;;  %2932 = vmatpush.bf16.msrb.mxu1 %v4238_v33  ;;  %v4234_v30 = vld [vmem:[%s5352_s1 + $0x40] sm:$0xff]  ;;  %v4273_v33 = vld [vmem:[%s5352_s1 + $0x178] sm:$0xff]  ;;  %v966_v36 = vrot.slane %v965_v28, 4  ;;  %v3577_v40 = vld [vmem:[#allocation2 + $0x24] sm:$0xf0]  ;;  %v956_v47 = vrot.slane %v954_v35, 5 }
  0x95   : > { %v4154_v39 = vld [vmem:[#allocation2 + $0x4] sm:$0xf]  ;;  %1165 = vst [vmem:[#allocation2 + $0x9c] sm:$0xf] %v3449_v38  ;;  %v4155_v45 = vld [vmem:[#allocation2 + $0xc] sm:$0xf] }
  0x96   : > { %3030 = vmatpush.bf16.msrb.mxu3 %v4254_v41  ;;  %3079 = vmatpush.bf16.msrb.mxu0 %v4262_v42  ;;  %v3583_v41 = vld [vmem:[#allocation2 + $0x8] sm:$0xf]  ;;  %v4258_v44 = vld [vmem:[%s5352_s1 + $0x100] sm:$0xff]  ;;  %v3585_v46 = vld [vmem:[#allocation2 + $0x2c] sm:$0xf0]  ;;  %v970_v48 = vrot.slane %v968_v37, 5  ;;  %v957_v54 = vsel %vm4730_vm2, %v952_v34, %v956_v47  ;;  %v3580_v58 = vor.u32 %v4154_v39, %v3577_v40 }
  0x97   : > { %2903 = vmatmul.bf16.gmra.mxu1 %v3684_v60  ;;  %2913 = vmatmul.bf16.gmra.mxu2 %v3756_v61  ;;  %v3450_v42 = vld [vmem:[%s4668_s10 + $0x148] sm:$0xf]  ;;  %v3465_v49 = vld [vmem:[%s4668_s10 + $0x1d0] sm:$0xf]  ;;  %v4159_v50 = vld [vmem:[#allocation2 + $0x28] sm:$0xf0]  ;;  %v3588_v60 = vor.u32 %v4155_v45, %v3585_v46 }
  0x98   : > { %2982 = vmatpush.bf16.msrb.mxu2 %v4245_v55  ;;  %2933 = vmatpush.bf16.msrb.mxu1 %v4237_v56  ;;  %1166 = vst [vmem:[#allocation2 + $0xc0] sm:$0xf] %v3450_v42  ;;  %v3466_v51 = vld [vmem:[%s4668_s10 + $0x1d8] sm:$0xf]  ;;  %v3591_v52 = vld [vmem:[#allocation2 + $0x10] sm:$0xf]  ;;  %v971_v55 = vsel %vm4730_vm2, %v966_v36, %v970_v48  ;;  %v3584_v59 = vor.u32 %v4159_v50, %v3583_v41 }
  0x99   : > { %2923 = vmatmul.bf16.gmra.mxu3 %v3828_v62  ;;  %2893 = vmatmul.bf16.gmra.mxu0 %v3612_v0  ;;  %1198 = vst [vmem:[#allocation2 + $0xa0] sm:$0xf] %v3465_v49  ;;  %v4160_v53 = vld [vmem:[#allocation2 + $0x30] sm:$0xf0]  ;;  %v4289_v56 = vld [vmem:[%s5352_s1 + $0x1f8] sm:$0xff]  ;;  %v4279_v13 = vld [vmem:[%s5352_s1 + $0x1a8] sm:$0xff] }
  0x9a   : > { %3031 = vmatpush.bf16.msrb.mxu3 %v4253_v63  ;;  %3080 = vmatpush.bf16.msrb.mxu0 %v4261_v1  ;;  %1199 = vst [vmem:[#allocation2 + $0xc4] sm:$0xf] %v3466_v51  ;;  %v4297_v57 = vld [vmem:[%s5352_s1 + $0x238] sm:$0xff]  ;;  %v3592_v61 = vor.u32 %v4160_v53, %v3591_v52  ;;  %v865_v62 = vld [vmem:[%s4668_s10 + $0x30] sm:$0xf]  ;;  %v4287_v14 = vld [vmem:[%s5352_s1 + $0x1e8] sm:$0xff] }
  0x9b   : > { %1132 = vst [vmem:[#allocation2 + $0x98] sm:$0xf] %v957_v54  ;;  %v867_v63 = vld [vmem:[%s4668_s10 + $0x38] sm:$0xf]  ;;  %v4280_v0 = vld [vmem:[%s5352_s1 + $0x1b0] sm:$0xff]  ;;  %v973_v2 = vshrl.u32 %v865_v62, 16 }
  0x9c   : > { %2983 = vmatpush.bf16.msrb.mxu2 %v4244_v7  ;;  %2934 = vmatpush.bf16.msrb.mxu1 %v4236_v8  ;;  %1133 = vst [vmem:[#allocation2 + $0xbc] sm:$0xf] %v971_v55  ;;  %v4272_v1 = vld [vmem:[%s5352_s1 + $0x170] sm:$0xff]  ;;  %v976_v4 = vshll.u32 %v865_v62, 16  ;;  %v987_v5 = vshrl.u32 %v867_v63, 16  ;;  %v990_v6 = vshll.u32 %v867_v63, 16 }
  0x9d   : > { %v4288_v7 = vld [vmem:[%s5352_s1 + $0x1f0] sm:$0xff]  ;;  %v975_v9 = vrot.slane %v973_v2, 4  ;;  %v4271_v15 = vld [vmem:[%s5352_s1 + $0x168] sm:$0xff]  ;;  %v868_v22 = vld [vmem:[%s4668_s10 + $0x3c] sm:$0x1] }
  0x9e   : > { %3032 = vmatpush.bf16.msrb.mxu3 %v4252_v16  ;;  %3081 = vmatpush.bf16.msrb.mxu0 %v4260_v17  ;;  %v4296_v8 = vld [vmem:[%s5352_s1 + $0x230] sm:$0xff]  ;;  %v978_v10 = vrot.slane %v976_v4, 5  ;;  %v989_v11 = vrot.slane %v987_v5, 4  ;;  %v992_v12 = vrot.slane %v990_v6, 5  ;;  %v4295_v17 = vld [vmem:[%s5352_s1 + $0x228] sm:$0xff] }
  0x9f   : > { %v3436_v19 = vld [vmem:[%s4668_s10 + $0xc8] sm:$0xf]  ;;  %v3451_v27 = vld [vmem:[%s4668_s10 + $0x150] sm:$0xf]  ;;  %v3452_v28 = vld [vmem:[%s4668_s10 + $0x158] sm:$0xf] }
  0xa0   : > { %2984 = vmatpush.bf16.msrb.mxu2 %v4243_v18  ;;  %2935 = vmatpush.bf16.msrb.mxu1 %v4235_v21  ;;  %v979_v16 = vor.u32 %v978_v10, %v975_v9  ;;  %v3435_v18 = vld [vmem:[%s4668_s10 + $0xc0] sm:$0xf]  ;;  %v993_v20 = vor.u32 %v992_v12, %v989_v11  ;;  %v866_v21 = vld [vmem:[%s4668_s10 + $0x34] sm:$0x1]  ;;  %844 = vst [vmem:[#allocation2 + $0x100] sm:$0xf] %v3436_v19 }
  0xa1   : > { %843 = vst [vmem:[#allocation2 + $0xdc] sm:$0xf] %v3435_v18  ;;  %v982_v24 = vshll.u32 %v866_v21, 16  ;;  %v4164_v34 = vld [vmem:[#allocation2 + $0x54] sm:$0xf] }
  0xa2   : > { %3033 = vmatpush.bf16.msrb.mxu3 %v4251_v25  ;;  %3082 = vmatpush.bf16.msrb.mxu0 %v4259_v26  ;;  %v980_v23 = vrot.slane %v979_v16, 4  ;;  %v994_v25 = vrot.slane %v993_v20, 4  ;;  %v996_v26 = vshll.u32 %v868_v22, 16  ;;  %1167 = vst [vmem:[#allocation2 + $0xe4] sm:$0xf] %v3451_v27 }
  0xa3   : > { %v984_v31 = vrot.slane %v982_v24, 5  ;;  %v3621_v35 = vld [vmem:[#allocation2 + $0x74] sm:$0xf0]  ;;  %1168 = vst [vmem:[#allocation2 + $0x108] sm:$0xf] %v3452_v28 }
  0xa4   : > { %2985 = vmatpush.bf16.msrb.mxu2 %v4242_v29  ;;  %2936 = vmatpush.bf16.msrb.mxu1 %v4234_v30  ;;  %v4163_v29 = vld [vmem:[#allocation2 + $0x4c] sm:$0xf]  ;;  %v3613_v30 = vld [vmem:[#allocation2 + $0x6c] sm:$0xf0]  ;;  %v3467_v36 = vld [vmem:[%s4668_s10 + $0x1e0] sm:$0xf]  ;;  %v3624_v45 = vor.u32 %v4164_v34, %v3621_v35 }
  0xa5   : > { %v4168_v37 = vld [vmem:[#allocation2 + $0x70] sm:$0xf0]  ;;  %v985_v38 = vsel %vm4730_vm2, %v980_v23, %v984_v31  ;;  %v3468_v40 = vld [vmem:[%s4668_s10 + $0x1e8] sm:$0xf]  ;;  %1200 = vst [vmem:[#allocation2 + $0xe8] sm:$0xf] %v3467_v36 }
  0xa6   : > { %3034 = vmatpush.bf16.msrb.mxu3 %v4250_v43  ;;  %3083 = vmatpush.bf16.msrb.mxu0 %v4258_v44  ;;  %v3627_v41 = vld [vmem:[#allocation2 + $0x58] sm:$0xf]  ;;  %v4169_v42 = vld [vmem:[#allocation2 + $0x78] sm:$0xf0]  ;;  %1134 = vst [vmem:[#allocation2 + $0xe0] sm:$0xf] %v985_v38  ;;  %v3616_v43 = vor.u32 %v4163_v29, %v3613_v30 }
  0xa7   : > { %2937 = vmatmul.bf16.vlgmr.msrb.gmra.mxu1 %v3580_v58  ;;  %2986 = vmatmul.bf16.vlgmr.msrb.gmra.mxu2 %v3584_v59  ;;  %1201 = vst [vmem:[#allocation2 + $0x10c] sm:$0xf] %v3468_v40  ;;  %v3628_v46 = vor.u32 %v4169_v42, %v3627_v41  ;;  %v869_v47 = vld [vmem:[%s4668_s10 + $0x48] sm:$0xf]  ;;  %v871_v48 = vld [vmem:[%s4668_s10 + $0x50] sm:$0xf] }
  0xa8   : > { %3174 = vmatpush.bf16.msra.mxu2 %v4281_v32  ;;  %3125 = vmatpush.bf16.msra.mxu1 %v4273_v33  ;;  %v998_v32 = vrot.slane %v996_v26, 5  ;;  %v3619_v33 = vld [vmem:[#allocation2 + $0x50] sm:$0xf]  ;;  %v1001_v49 = vshrl.u32 %v869_v47, 16  ;;  %v1004_v50 = vshll.u32 %v869_v47, 16  ;;  %v1015_v51 = vshrl.u32 %v871_v48, 16 }
  0xa9   : > { %3035 = vmatmul.bf16.vlgmr.msrb.gmra.mxu3 %v3588_v60  ;;  %3084 = vmatmul.bf16.vlgmr.msrb.gmra.mxu0 %v3592_v61  ;;  %v3620_v44 = vor.u32 %v4168_v37, %v3619_v33  ;;  %v1018_v52 = vshll.u32 %v871_v48, 16  ;;  %v4270_v59 = vld [vmem:[%s5352_s1 + $0x160] sm:$0xff]  ;;  %v3437_v62 = vld [vmem:[%s4668_s10 + $0xd8] sm:$0xf]  ;;  %v872_v2 = vld [vmem:[%s4668_s10 + $0x54] sm:$0x1] }
  0xaa   : > { %3223 = vmatpush.bf16.msra.mxu3 %v4289_v56  ;;  %3272 = vmatpush.bf16.msra.mxu0 %v4297_v57  ;;  %v999_v39 = vsel %vm4730_vm2, %v994_v25, %v998_v32  ;;  %v1003_v53 = vrot.slane %v1001_v49, 4  ;;  %v1006_v54 = vrot.slane %v1004_v50, 5  ;;  %v1017_v55 = vrot.slane %v1015_v51, 4  ;;  %v4278_v56 = vld [vmem:[%s5352_s1 + $0x1a0] sm:$0xff]  ;;  %845 = vst [vmem:[#allocation2 + $0x124] sm:$0xf] %v3437_v62 }
  0xab   : > { %1135 = vst [vmem:[#allocation2 + $0x104] sm:$0xf] %v999_v39  ;;  %v4286_v57 = vld [vmem:[%s5352_s1 + $0x1e0] sm:$0xff]  ;;  %v1020_v58 = vrot.slane %v1018_v52, 5  ;;  %v3454_v9 = vld [vmem:[%s4668_s10 + $0x170] sm:$0xf] }
  0xac   : > { %3175 = vmatpush.bf16.msra.mxu2 %v4280_v0  ;;  %3126 = vmatpush.bf16.msra.mxu1 %v4272_v1  ;;  %v4294_v60 = vld [vmem:[%s5352_s1 + $0x220] sm:$0xff]  ;;  %v1007_v61 = vor.u32 %v1006_v54, %v1003_v53  ;;  %v870_v1 = vld [vmem:[%s4668_s10 + $0x4c] sm:$0x1]  ;;  %v4172_v10 = vld [vmem:[#allocation2 + $0x94] sm:$0xf] }
  0xad   : > { %v3438_v63 = vld [vmem:[%s4668_s10 + $0xe0] sm:$0xf]  ;;  %v1021_v0 = vor.u32 %v1020_v58, %v1017_v55  ;;  %v1010_v5 = vshll.u32 %v870_v1, 16  ;;  %v3649_v11 = vld [vmem:[#allocation2 + $0xb4] sm:$0xf0] }
  0xae   : > { %3224 = vmatpush.bf16.msra.mxu3 %v4288_v7  ;;  %3273 = vmatpush.bf16.msra.mxu0 %v4296_v8  ;;  %846 = vst [vmem:[#allocation2 + $0x148] sm:$0xf] %v3438_v63  ;;  %v1008_v4 = vrot.slane %v1007_v61, 4  ;;  %v1024_v7 = vshll.u32 %v872_v2, 16  ;;  %v3453_v8 = vld [vmem:[%s4668_s10 + $0x168] sm:$0xf]  ;;  %v3652_v24 = vor.u32 %v4172_v10, %v3649_v11 }
  0xaf   : > { %v1022_v6 = vrot.slane %v1021_v0, 4  ;;  %v1012_v12 = vrot.slane %v1010_v5, 5  ;;  %1169 = vst [vmem:[#allocation2 + $0x12c] sm:$0xf] %v3453_v8  ;;  %v3657_v16 = vld [vmem:[#allocation2 + $0xbc] sm:$0xf0] }
  0xb0   : > { %3176 = vmatpush.bf16.msra.mxu2 %v4279_v13  ;;  %3127 = vmatpush.bf16.msra.mxu1 %v4271_v15  ;;  %v1026_v13 = vrot.slane %v1024_v7, 5  ;;  %v4173_v15 = vld [vmem:[#allocation2 + $0x9c] sm:$0xf]  ;;  %1170 = vst [vmem:[#allocation2 + $0x150] sm:$0xf] %v3454_v9 }
  0xb1   : > { %v4177_v18 = vld [vmem:[#allocation2 + $0xb8] sm:$0xf0]  ;;  %v1013_v19 = vsel %vm4730_vm2, %v1008_v4, %v1012_v12  ;;  %v3470_v21 = vld [vmem:[%s4668_s10 + $0x200] sm:$0xf]  ;;  %v4178_v23 = vld [vmem:[#allocation2 + $0xc0] sm:$0xf0]  ;;  %v3660_v26 = vor.u32 %v4173_v15, %v3657_v16 }
  0xb2   : > { %3225 = vmatpush.bf16.msra.mxu3 %v4287_v14  ;;  %3274 = vmatpush.bf16.msra.mxu0 %v4295_v17  ;;  %v3655_v14 = vld [vmem:[#allocation2 + $0x98] sm:$0xf]  ;;  %v1027_v20 = vsel %vm4730_vm2, %v1022_v6, %v1026_v13  ;;  %v3663_v22 = vld [vmem:[#allocation2 + $0xa0] sm:$0xf]  ;;  %1136 = vst [vmem:[#allocation2 + $0x128] sm:$0xf] %v1013_v19 }
  0xb3   : > { %v3469_v17 = vld [vmem:[%s4668_s10 + $0x1f8] sm:$0xf]  ;;  %1137 = vst [vmem:[#allocation2 + $0x14c] sm:$0xf] %v1027_v20  ;;  %v3656_v25 = vor.u32 %v4177_v18, %v3655_v14  ;;  %v3664_v27 = vor.u32 %v4178_v23, %v3663_v22  ;;  %v875_v29 = vld [vmem:[%s4668_s10 + $0x60] sm:$0xf] }
  0xb4   : > { %3177 = vmatpush.bf16.msra.mxu2 %v4278_v56  ;;  %3128 = vmatpush.bf16.msra.mxu1 %v4270_v59  ;;  %1202 = vst [vmem:[#allocation2 + $0x130] sm:$0xf] %v3469_v17  ;;  %v873_v28 = vld [vmem:[%s4668_s10 + $0x58] sm:$0xf]  ;;  %v1043_v32 = vshrl.u32 %v875_v29, 16  ;;  %v1046_v33 = vshll.u32 %v875_v29, 16 }
  0xb5   : > { %1203 = vst [vmem:[#allocation2 + $0x154] sm:$0xf] %v3470_v21  ;;  %v1029_v30 = vshrl.u32 %v873_v28, 16  ;;  %v1032_v31 = vshll.u32 %v873_v28, 16  ;;  %v4277_v37 = vld [vmem:[%s5352_s1 + $0x198] sm:$0xff]  ;;  %v4276_v18 = vld [vmem:[%s5352_s1 + $0x190] sm:$0xff] }
  0xb6   : > { %3226 = vmatpush.bf16.msra.mxu3 %v4286_v57  ;;  %3275 = vmatpush.bf16.msra.mxu0 %v4294_v60  ;;  %v1045_v36 = vrot.slane %v1043_v32, 4  ;;  %v4285_v38 = vld [vmem:[%s5352_s1 + $0x1d8] sm:$0xff]  ;;  %v1048_v39 = vrot.slane %v1046_v33, 5  ;;  %v876_v47 = vld [vmem:[%s4668_s10 + $0x64] sm:$0x1]  ;;  %v4284_v19 = vld [vmem:[%s5352_s1 + $0x1d0] sm:$0xff] }
  0xb7   : > { %2942 = vmatmul.bf16.gmra.mxu1 %v3616_v43  ;;  %2991 = vmatmul.bf16.gmra.mxu2 %v3620_v44  ;;  %v1031_v34 = vrot.slane %v1029_v30, 4  ;;  %v1034_v35 = vrot.slane %v1032_v31, 5  ;;  %v4269_v40 = vld [vmem:[%s5352_s1 + $0x158] sm:$0xff]  ;;  %v3439_v43 = vld [vmem:[%s4668_s10 + $0xe8] sm:$0xf]  ;;  %v1052_v51 = vshll.u32 %v876_v47, 16 }
  0xb8   : > { %v4293_v41 = vld [vmem:[%s5352_s1 + $0x218] sm:$0xff]  ;;  %3178 = vmatpush.bf16.msra.mxu2 %v4277_v37  ;;  %v3440_v44 = vld [vmem:[%s4668_s10 + $0xf0] sm:$0xf]  ;;  %3129 = vmatpush.bf16.msra.mxu1 %v4269_v40  ;;  %847 = vst [vmem:[#allocation2 + $0x16c] sm:$0xf] %v3439_v43 }
  0xb9   : > { %3040 = vmatmul.bf16.gmra.mxu3 %v3624_v45  ;;  %3089 = vmatmul.bf16.gmra.mxu0 %v3628_v46  ;;  %v1035_v42 = vor.u32 %v1034_v35, %v1031_v34  ;;  %v1049_v45 = vor.u32 %v1048_v39, %v1045_v36  ;;  %v874_v46 = vld [vmem:[%s4668_s10 + $0x5c] sm:$0x1]  ;;  %848 = vst [vmem:[#allocation2 + $0x190] sm:$0xf] %v3440_v44  ;;  %v3455_v52 = vld [vmem:[%s4668_s10 + $0x178] sm:$0xf] }
  0xba   : > { %3227 = vmatpush.bf16.msra.mxu3 %v4285_v38  ;;  %3276 = vmatpush.bf16.msra.mxu0 %v4293_v41  ;;  %v1038_v49 = vshll.u32 %v874_v46, 16  ;;  %v3456_v53 = vld [vmem:[%s4668_s10 + $0x180] sm:$0xf]  ;;  %v4181_v54 = vld [vmem:[#allocation2 + $0xdc] sm:$0xf]  ;;  %v1054_v57 = vrot.slane %v1052_v51, 5 }
  0xbb   : > { %v1036_v48 = vrot.slane %v1035_v42, 4  ;;  %v1050_v50 = vrot.slane %v1049_v45, 4  ;;  %v3685_v55 = vld [vmem:[#allocation2 + $0xfc] sm:$0xf0]  ;;  %1171 = vst [vmem:[#allocation2 + $0x174] sm:$0xf] %v3455_v52 }
  0xbc   : > { %v1040_v56 = vrot.slane %v1038_v49, 5  ;;  %v3691_v58 = vld [vmem:[#allocation2 + $0xe0] sm:$0xf]  ;;  %v4182_v59 = vld [vmem:[#allocation2 + $0xe4] sm:$0xf]  ;;  %v3688_v5 = vor.u32 %v4181_v54, %v3685_v55  ;;  %v4268_v21 = vld [vmem:[%s5352_s1 + $0x150] sm:$0xff]  ;;  %3179 = vmatpush.bf16.msra.mxu2 %v4276_v18 }
  0xbd   : > { %v3693_v60 = vld [vmem:[#allocation2 + $0x104] sm:$0xf0]  ;;  %1172 = vst [vmem:[#allocation2 + $0x198] sm:$0xf] %v3456_v53  ;;  %v4186_v62 = vld [vmem:[#allocation2 + $0x100] sm:$0xf0]  ;;  %v1055_v0 = vsel %vm4730_vm2, %v1050_v50, %v1054_v57  ;;  %3130 = vmatpush.bf16.msra.mxu1 %v4268_v21 }
  0xbe   : > { %v3471_v61 = vld [vmem:[%s4668_s10 + $0x208] sm:$0xf]  ;;  %v1041_v63 = vsel %vm4730_vm2, %v1036_v48, %v1040_v56  ;;  %v3472_v1 = vld [vmem:[%s4668_s10 + $0x210] sm:$0xf]  ;;  %v4187_v4 = vld [vmem:[#allocation2 + $0x108] sm:$0xf0]  ;;  %v3692_v6 = vor.u32 %v4186_v62, %v3691_v58  ;;  %v3696_v7 = vor.u32 %v4182_v59, %v3693_v60  ;;  %3228 = vmatpush.bf16.msra.mxu3 %v4284_v19 }
  0xbf   : > { %1204 = vst [vmem:[#allocation2 + $0x178] sm:$0xf] %v3471_v61  ;;  %v3699_v2 = vld [vmem:[#allocation2 + $0xe8] sm:$0xf]  ;;  %v879_v10 = vld [vmem:[%s4668_s10 + $0x70] sm:$0xf] }
  0xc0   : > { %1138 = vst [vmem:[#allocation2 + $0x170] sm:$0xf] %v1041_v63  ;;  %v3700_v8 = vor.u32 %v4187_v4, %v3699_v2  ;;  %v877_v9 = vld [vmem:[%s4668_s10 + $0x68] sm:$0xf]  ;;  %v1071_v13 = vshrl.u32 %v879_v10, 16  ;;  %v1074_v14 = vshll.u32 %v879_v10, 16 }
  0xc1   : > { %1139 = vst [vmem:[#allocation2 + $0x194] sm:$0xf] %v1055_v0  ;;  %v1057_v11 = vshrl.u32 %v877_v9, 16  ;;  %v1060_v12 = vshll.u32 %v877_v9, 16  ;;  %v4292_v22 = vld [vmem:[%s5352_s1 + $0x210] sm:$0xff]  ;;  %v4275_v61 = vld [vmem:[%s5352_s1 + $0x188] sm:$0xff] }
  0xc2   : > { %1205 = vst [vmem:[#allocation2 + $0x19c] sm:$0xf] %v3472_v1  ;;  %v1073_v17 = vrot.slane %v1071_v13, 4  ;;  %v1076_v20 = vrot.slane %v1074_v14, 5  ;;  %3277 = vmatpush.bf16.msra.mxu0 %v4292_v22  ;;  %v3441_v31 = vld [vmem:[%s4668_s10 + $0xf8] sm:$0xf]  ;;  %3180 = vmatpush.bf16.msra.mxu2 %v4275_v61 }
  0xc3   : > { %v1059_v15 = vrot.slane %v1057_v11, 4  ;;  %v1062_v16 = vrot.slane %v1060_v12, 5  ;;  %v3442_v32 = vld [vmem:[%s4668_s10 + $0x100] sm:$0xf]  ;;  %v4190_v34 = vld [vmem:[#allocation2 + $0x124] sm:$0xf] }
  0xc4   : > { %v3721_v35 = vld [vmem:[#allocation2 + $0x144] sm:$0xf0]  ;;  %849 = vst [vmem:[#allocation2 + $0x1b4] sm:$0xf] %v3441_v31  ;;  %v4191_v38 = vld [vmem:[#allocation2 + $0x12c] sm:$0xf] }
  0xc5   : > { %v1063_v23 = vor.u32 %v1062_v16, %v1059_v15  ;;  %v3727_v37 = vld [vmem:[#allocation2 + $0x128] sm:$0xf]  ;;  %v3729_v39 = vld [vmem:[#allocation2 + $0x14c] sm:$0xf0]  ;;  %850 = vst [vmem:[#allocation2 + $0x1d8] sm:$0xf] %v3442_v32  ;;  %v3724_v49 = vor.u32 %v4190_v34, %v3721_v35 }
  0xc6   : > { %v3735_v40 = vld [vmem:[#allocation2 + $0x130] sm:$0xf]  ;;  %v3457_v42 = vld [vmem:[%s4668_s10 + $0x188] sm:$0xf]  ;;  %v4195_v43 = vld [vmem:[#allocation2 + $0x148] sm:$0xf0]  ;;  %v3732_v51 = vor.u32 %v4191_v38, %v3729_v39 }
  0xc7   : > { %2947 = vmatmul.bf16.gmra.mxu1 %v3652_v24  ;;  %2996 = vmatmul.bf16.gmra.mxu2 %v3656_v25  ;;  %v878_v24 = vld [vmem:[%s4668_s10 + $0x6c] sm:$0x1]  ;;  %v1077_v25 = vor.u32 %v1076_v20, %v1073_v17  ;;  %v3458_v45 = vld [vmem:[%s4668_s10 + $0x190] sm:$0xf]  ;;  %v4196_v46 = vld [vmem:[#allocation2 + $0x150] sm:$0xf0]  ;;  %v3728_v50 = vor.u32 %v4195_v43, %v3727_v37 }
  0xc8   : > { %v1066_v28 = vshll.u32 %v878_v24, 16  ;;  %v3473_v47 = vld [vmem:[%s4668_s10 + $0x218] sm:$0xf]  ;;  %1173 = vst [vmem:[#allocation2 + $0x1bc] sm:$0xf] %v3457_v42  ;;  %v3736_v52 = vor.u32 %v4196_v46, %v3735_v40  ;;  %v4283_v62 = vld [vmem:[%s5352_s1 + $0x1c8] sm:$0xff] }
  0xc9   : > { %3045 = vmatmul.bf16.gmra.mxu3 %v3660_v26  ;;  %3094 = vmatmul.bf16.gmra.mxu0 %v3664_v27  ;;  %v880_v26 = vld [vmem:[%s4668_s10 + $0x74] sm:$0x1]  ;;  %v1064_v27 = vrot.slane %v1063_v23, 4  ;;  %v1078_v29 = vrot.slane %v1077_v25, 4  ;;  %v3474_v48 = vld [vmem:[%s4668_s10 + $0x220] sm:$0xf] }
  0xca   : > { %v1080_v30 = vshll.u32 %v880_v26, 16  ;;  %v1068_v33 = vrot.slane %v1066_v28, 5  ;;  %1174 = vst [vmem:[#allocation2 + $0x1e0] sm:$0xf] %v3458_v45  ;;  %v881_v53 = vld [vmem:[%s4668_s10 + $0x78] sm:$0xf]  ;;  %3229 = vmatpush.bf16.msra.mxu3 %v4283_v62 }
  0xcb   : > { %1206 = vst [vmem:[#allocation2 + $0x1c0] sm:$0xf] %v3473_v47  ;;  %v883_v54 = vld [vmem:[%s4668_s10 + $0x80] sm:$0xf]  ;;  %v1085_v55 = vshrl.u32 %v881_v53, 16  ;;  %v1088_v56 = vshll.u32 %v881_v53, 16 }
  0xcc   : > { %v1082_v36 = vrot.slane %v1080_v30, 5  ;;  %v1069_v41 = vsel %vm4730_vm2, %v1064_v27, %v1068_v33  ;;  %1207 = vst [vmem:[#allocation2 + $0x1e4] sm:$0xf] %v3474_v48  ;;  %v1099_v57 = vshrl.u32 %v883_v54, 16  ;;  %v1102_v58 = vshll.u32 %v883_v54, 16  ;;  %v4267_v9 = vld [vmem:[%s5352_s1 + $0x148] sm:$0xff] }
  0xcd   : > { %1140 = vst [vmem:[#allocation2 + $0x1b8] sm:$0xf] %v1069_v41  ;;  %v1087_v59 = vrot.slane %v1085_v55, 4  ;;  %v1090_v60 = vrot.slane %v1088_v56, 5  ;;  %v882_v1 = vld [vmem:[%s4668_s10 + $0x7c] sm:$0x1]  ;;  %3131 = vmatpush.bf16.msra.mxu1 %v4267_v9 }
  0xce   : > { %v1083_v44 = vsel %vm4730_vm2, %v1078_v29, %v1082_v36  ;;  %v1101_v63 = vrot.slane %v1099_v57, 4  ;;  %v1104_v0 = vrot.slane %v1102_v58, 5  ;;  %v884_v2 = vld [vmem:[%s4668_s10 + $0x84] sm:$0x1]  ;;  %v3443_v13 = vld [vmem:[%s4668_s10 + $0x108] sm:$0xf] }
  0xcf   : > { %1141 = vst [vmem:[#allocation2 + $0x1dc] sm:$0xf] %v1083_v44  ;;  %v1091_v4 = vor.u32 %v1090_v60, %v1087_v59  ;;  %v3444_v14 = vld [vmem:[%s4668_s10 + $0x110] sm:$0xf]  ;;  %v4199_v15 = vld [vmem:[#allocation2 + $0x16c] sm:$0xf] }
  0xd0   : > { %v3757_v16 = vld [vmem:[#allocation2 + $0x18c] sm:$0xf0]  ;;  %v4291_v17 = vld [vmem:[%s5352_s1 + $0x208] sm:$0xff]  ;;  %851 = vst [vmem:[#allocation2 + $0x1fc] sm:$0xf] %v3443_v13  ;;  %v4274_v42 = vld [vmem:[%s5352_s1 + $0x180] sm:$0xff] }
  0xd1   : > { %v3763_v20 = vld [vmem:[#allocation2 + $0x170] sm:$0xf]  ;;  %v4200_v21 = vld [vmem:[#allocation2 + $0x174] sm:$0xf]  ;;  %v3765_v22 = vld [vmem:[#allocation2 + $0x194] sm:$0xf0]  ;;  %3278 = vmatpush.bf16.msra.mxu0 %v4291_v17  ;;  %v3760_v30 = vor.u32 %v4199_v15, %v3757_v16  ;;  %3181 = vmatpush.bf16.msra.mxu2 %v4274_v42 }
  0xd2   : > { %v3771_v23 = vld [vmem:[#allocation2 + $0x178] sm:$0xf]  ;;  %852 = vst [vmem:[#allocation2 + $0x220] sm:$0xf] %v3444_v14  ;;  %v4204_v25 = vld [vmem:[#allocation2 + $0x190] sm:$0xf0]  ;;  %v3768_v32 = vor.u32 %v4200_v21, %v3765_v22 }
  0xd3   : > { %v3459_v24 = vld [vmem:[%s4668_s10 + $0x198] sm:$0xf]  ;;  %v3460_v26 = vld [vmem:[%s4668_s10 + $0x1a0] sm:$0xf]  ;;  %v4205_v27 = vld [vmem:[#allocation2 + $0x198] sm:$0xf0]  ;;  %v3764_v31 = vor.u32 %v4204_v25, %v3763_v20 }
  0xd4   : > { %v3475_v28 = vld [vmem:[%s4668_s10 + $0x228] sm:$0xf]  ;;  %1175 = vst [vmem:[#allocation2 + $0x204] sm:$0xf] %v3459_v24  ;;  %v3476_v29 = vld [vmem:[%s4668_s10 + $0x230] sm:$0xf]  ;;  %v3772_v33 = vor.u32 %v4205_v27, %v3771_v23 }
  0xd5   : > { %1176 = vst [vmem:[#allocation2 + $0x228] sm:$0xf] %v3460_v26  ;;  %v3477_v34 = vld [vmem:[%s4668_s10 + $0x120] sm:$0xf]  ;;  %v3479_v35 = vld [vmem:[%s4668_s10 + $0x128] sm:$0xf] }
  0xd6   : > { %1208 = vst [vmem:[#allocation2 + $0x208] sm:$0xf] %v3475_v28  ;;  %v1243_v36 = vshrl.u32 %v3477_v34, 16  ;;  %v1246_v37 = vshll.u32 %v3477_v34, 16  ;;  %v1257_v38 = vshrl.u32 %v3479_v35, 16  ;;  %v1260_v39 = vshll.u32 %v3479_v35, 16 }
  0xd7   : > { %2952 = vmatmul.bf16.gmra.mxu1 %v3688_v5  ;;  %3001 = vmatmul.bf16.gmra.mxu2 %v3692_v6  ;;  %v1094_v5 = vshll.u32 %v882_v1, 16  ;;  %v1105_v6 = vor.u32 %v1104_v0, %v1101_v63  ;;  %1209 = vst [vmem:[#allocation2 + $0x22c] sm:$0xf] %v3476_v29  ;;  %v4282_v43 = vld [vmem:[%s5352_s1 + $0x1c0] sm:$0xff]  ;;  %v3541_v46 = vld [vmem:[%s4668_s10 + $0x8] sm:$0xf] }
  0xd8   : > { %v1245_v40 = vrot.slane %v1243_v36, 4  ;;  %v1248_v41 = vrot.slane %v1246_v37, 5  ;;  %v1259_v44 = vrot.slane %v1257_v38, 4  ;;  %v1262_v45 = vrot.slane %v1260_v39, 5  ;;  %v3478_v47 = vld [vmem:[%s4668_s10 + $0x124] sm:$0x1]  ;;  %3230 = vmatpush.bf16.msra.mxu3 %v4282_v43 }
  0xd9   : > { %3050 = vmatmul.bf16.gmra.mxu3 %v3696_v7  ;;  %3099 = vmatmul.bf16.gmra.mxu0 %v3700_v8  ;;  %v1108_v7 = vshll.u32 %v884_v2, 16  ;;  %v1092_v8 = vrot.slane %v1091_v4, 4  ;;  %v1096_v10 = vrot.slane %v1094_v5, 5  ;;  %v1106_v11 = vrot.slane %v1105_v6, 4  ;;  %v3480_v48 = vld [vmem:[%s4668_s10 + $0x12c] sm:$0x1] }
  0xda   : > { %v3543_v54 = vld [vmem:[%s4668_s10 + $0x10] sm:$0xf]  ;;  %v1597_v55 = vshrl.u32 %v3541_v46, 16  ;;  %v4266_v56 = vld [vmem:[%s5352_s1 + $0x140] sm:$0xff]  ;;  %v3542_v60 = vld [vmem:[%s4668_s10 + $0xc] sm:$0x1] }
  0xdb   : > { %v1110_v12 = vrot.slane %v1108_v7, 5  ;;  %v1097_v18 = vsel %vm4730_vm2, %v1092_v8, %v1096_v10  ;;  %v4208_v61 = vld [vmem:[#allocation2 + $0x1b4] sm:$0xf]  ;;  %v3793_v62 = vld [vmem:[#allocation2 + $0x1d4] sm:$0xf0]  ;;  %3132 = vmatpush.bf16.msra.mxu1 %v4266_v56  ;;  %v4290_v5 = vld [vmem:[%s5352_s1 + $0x200] sm:$0xff] }
  0xdc   : > { %1142 = vst [vmem:[#allocation2 + $0x200] sm:$0xf] %v1097_v18  ;;  %v3799_v63 = vld [vmem:[#allocation2 + $0x1b8] sm:$0xf]  ;;  %v4213_v0 = vld [vmem:[#allocation2 + $0x1d8] sm:$0xf0]  ;;  %3279 = vmatpush.bf16.msra.mxu0 %v4290_v5  ;;  %v3796_v23 = vor.u32 %v4208_v61, %v3793_v62 }
  0xdd   : > { %v1111_v19 = vsel %vm4730_vm2, %v1106_v11, %v1110_v12  ;;  %v3509_v1 = vld [vmem:[%s4668_s10 + $0x8] sm:$0xf]  ;;  %v3510_v2 = vld [vmem:[%s4668_s10 + $0x10] sm:$0xf]  ;;  %v3544_v4 = vld [vmem:[%s4668_s10 + $0x14] sm:$0x1]  ;;  %v3800_v24 = vor.u32 %v4213_v0, %v3799_v63 }
  0xde   : > { %1143 = vst [vmem:[#allocation2 + $0x224] sm:$0xf] %v1111_v19  ;;  %v3525_v8 = vld [vmem:[%s4668_s10 + $0x98] sm:$0xf]  ;;  %v1599_v9 = vrot.slane %v1597_v55, 4  ;;  %v1600_v14 = vshll.u32 %v3541_v46, 16 }
  0xdf   : > { %1515 = vst [vmem:[#allocation2 + $0x18] sm:$0xf] %v3509_v1  ;;  %v4209_v10 = vld [vmem:[#allocation2 + $0x1bc] sm:$0xf]  ;;  %v3801_v11 = vld [vmem:[#allocation2 + $0x1dc] sm:$0xf0] }
  0xe0   : > { %v3807_v12 = vld [vmem:[#allocation2 + $0x1c0] sm:$0xf]  ;;  %v4214_v13 = vld [vmem:[#allocation2 + $0x1e0] sm:$0xf0]  ;;  %v1606_v15 = vshll.u32 %v3542_v60, 16  ;;  %v1611_v16 = vshrl.u32 %v3543_v54, 16 }
  0xe1   : > { %v1614_v17 = vshll.u32 %v3543_v54, 16  ;;  %v3526_v18 = vld [vmem:[%s4668_s10 + $0xa0] sm:$0xf]  ;;  %v1620_v19 = vshll.u32 %v3544_v4, 16  ;;  %1516 = vst [vmem:[#allocation2 + $0x3c] sm:$0xf] %v3510_v2 }
  0xe2   : > { %v1602_v20 = vrot.slane %v1600_v14, 5  ;;  %v1613_v21 = vrot.slane %v1611_v16, 4  ;;  %1548 = vst [vmem:[#allocation2 + $0x1c] sm:$0xf] %v3525_v8  ;;  %v1608_v26 = vrot.slane %v1606_v15, 5 }
  0xe3   : > { %v1616_v22 = vrot.slane %v1614_v17, 5  ;;  %1549 = vst [vmem:[#allocation2 + $0x40] sm:$0xf] %v3526_v18  ;;  %v1622_v28 = vrot.slane %v1620_v19, 5  ;;  %v5045_v46 = vld [vmem:[%s5353_s2] ss:$0 sm:$0xff] }
  0xe4   : > { %v1603_v25 = vor.u32 %v1602_v20, %v1599_v9  ;;  %v3546_v56 = vld [vmem:[%s4668_s10 + $0x1c] sm:$0x1]  ;;  %v3547_v63 = vld [vmem:[%s4668_s10 + $0x20] sm:$0xf]  ;;  %v3548_v0 = vld [vmem:[%s4668_s10 + $0x24] sm:$0x1] }
  0xe5   : > { %v1617_v27 = vor.u32 %v1616_v22, %v1613_v21  ;;  %v4217_v2 = vld [vmem:[#allocation2 + $0x1fc] sm:$0xf]  ;;  %v3829_v4 = vld [vmem:[#allocation2 + $0x21c] sm:$0xf0]  ;;  %v3511_v8 = vld [vmem:[%s4668_s10 + $0x18] sm:$0xf] }
  0xe6   : > { %v1604_v35 = vrot.slane %v1603_v25, 4  ;;  %v3835_v5 = vld [vmem:[#allocation2 + $0x200] sm:$0xf]  ;;  %1517 = vst [vmem:[#allocation2 + $0x60] sm:$0xf] %v3511_v8  ;;  %v1634_v22 = vshll.u32 %v3546_v56, 16 }
  0xe7   : > { %2957 = vmatmul.bf16.gmra.mxu1 %v3724_v49  ;;  %3006 = vmatmul.bf16.gmra.mxu2 %v3728_v50  ;;  %v1249_v49 = vor.u32 %v1248_v41, %v1245_v40  ;;  %v1252_v50 = vshll.u32 %v3478_v47, 16  ;;  %v1618_v36 = vrot.slane %v1617_v27, 4  ;;  %v3484_v47 = vld [vmem:[%s4668_s10 + $0x13c] sm:$0x1]  ;;  %v3512_v9 = vld [vmem:[%s4668_s10 + $0x20] sm:$0xf]  ;;  %v3832_v27 = vor.u32 %v4217_v2, %v3829_v4 }
  0xe8   : > { %v1609_v41 = vsel %vm4730_vm2, %v1604_v35, %v1608_v26  ;;  %v1294_v55 = vshll.u32 %v3484_v47, 16  ;;  %v3527_v14 = vld [vmem:[%s4668_s10 + $0xa8] sm:$0xf]  ;;  %v4223_v16 = vld [vmem:[#allocation2 + $0x228] sm:$0xf0]  ;;  %v1648_v25 = vshll.u32 %v3548_v0, 16 }
  0xe9   : > { %3055 = vmatmul.bf16.gmra.mxu3 %v3732_v51  ;;  %3104 = vmatmul.bf16.gmra.mxu0 %v3736_v52  ;;  %v1263_v51 = vor.u32 %v1262_v45, %v1259_v44  ;;  %v1266_v52 = vshll.u32 %v3480_v48, 16  ;;  %v1250_v53 = vrot.slane %v1249_v49, 4  ;;  %v1254_v57 = vrot.slane %v1252_v50, 5  ;;  %1836 = vst [vmem:[#allocation2 + $0x20] sm:$0xf] %v1609_v41 }
  0xea   : > { %v1623_v42 = vsel %vm4730_vm2, %v1618_v36, %v1622_v28  ;;  %v3482_v44 = vld [vmem:[%s4668_s10 + $0x134] sm:$0x1]  ;;  %v3545_v45 = vld [vmem:[%s4668_s10 + $0x18] sm:$0xf]  ;;  %v3843_v15 = vld [vmem:[#allocation2 + $0x208] sm:$0xf] }
  0xeb   : > { %v1264_v58 = vrot.slane %v1263_v51, 4  ;;  %v1268_v59 = vrot.slane %v1266_v52, 5  ;;  %v1255_v6 = vsel %vm4730_vm2, %v1250_v53, %v1254_v57  ;;  %1837 = vst [vmem:[#allocation2 + $0x44] sm:$0xf] %v1623_v42  ;;  %v1280_v50 = vshll.u32 %v3482_v44, 16 }
  0xec   : > { %1482 = vst [vmem:[#allocation2 + $0x14] sm:$0xf] %v1255_v6  ;;  %v1625_v57 = vshrl.u32 %v3545_v45, 16  ;;  %v4222_v6 = vld [vmem:[#allocation2 + $0x220] sm:$0xf0]  ;;  %v1628_v21 = vshll.u32 %v3545_v45, 16 }
  0xed   : > { %v1269_v7 = vsel %vm4730_vm2, %v1264_v58, %v1268_v59  ;;  %v1282_v61 = vrot.slane %v1280_v50, 5  ;;  %1518 = vst [vmem:[#allocation2 + $0x84] sm:$0xf] %v3512_v9  ;;  %v3528_v20 = vld [vmem:[%s4668_s10 + $0xb0] sm:$0xf]  ;;  %v3836_v28 = vor.u32 %v4222_v6, %v3835_v5  ;;  %v1636_v41 = vrot.slane %v1634_v22, 5 }
  0xee   : > { %1483 = vst [vmem:[#allocation2 + $0x38] sm:$0xf] %v1269_v7  ;;  %v1296_v7 = vrot.slane %v1294_v55, 5  ;;  %v1627_v17 = vrot.slane %v1625_v57, 4  ;;  %v3485_v42 = vld [vmem:[%s4668_s10 + $0x140] sm:$0xf] }
  0xef   : > { %1550 = vst [vmem:[#allocation2 + $0x64] sm:$0xf] %v3527_v14  ;;  %v1650_v47 = vrot.slane %v1648_v25, 5  ;;  %v3599_v22 = vld [vmem:[#allocation2 + $0x18] sm:$0xf] }
  0xf0   : > { %1551 = vst [vmem:[#allocation2 + $0x88] sm:$0xf] %v3528_v20  ;;  %v3513_v25 = vld [vmem:[%s4668_s10 + $0x28] sm:$0xf] }
  0xf1   : > { %1519 = vst [vmem:[#allocation2 + $0xa8] sm:$0xf] %v3513_v25  ;;  %v3553_v25 = vld [vmem:[%s4668_s10 + $0x38] sm:$0xf] }
  0xf3   : > { %v4156_v20 = vld [vmem:[#allocation2 + $0x14] sm:$0xf] }
  0xf7   : > { %2962 = vmatmul.bf16.gmra.mxu1 %v3760_v30  ;;  %3011 = vmatmul.bf16.gmra.mxu2 %v3764_v31  ;;  %v3804_v30 = vor.u32 %v4209_v10, %v3801_v11  ;;  %v3808_v31 = vor.u32 %v4214_v13, %v3807_v12  ;;  %v4218_v10 = vld [vmem:[#allocation2 + $0x204] sm:$0xf]  ;;  %v3837_v11 = vld [vmem:[#allocation2 + $0x224] sm:$0xf0] }
  0xf9   : > { %3060 = vmatmul.bf16.gmra.mxu3 %v3768_v32  ;;  %3109 = vmatmul.bf16.gmra.mxu0 %v3772_v33  ;;  %v3481_v32 = vld [vmem:[%s4668_s10 + $0x130] sm:$0xf]  ;;  %v3483_v33 = vld [vmem:[%s4668_s10 + $0x138] sm:$0xf] }
  0xfa   : > { %v1271_v37 = vshrl.u32 %v3481_v32, 16  ;;  %v1274_v38 = vshll.u32 %v3481_v32, 16  ;;  %v1285_v39 = vshrl.u32 %v3483_v33, 16  ;;  %v1288_v40 = vshll.u32 %v3483_v33, 16 }
  0xfb   : > { %v3840_v33 = vor.u32 %v4218_v10, %v3837_v11  ;;  %v3549_v11 = vld [vmem:[%s4668_s10 + $0x28] sm:$0xf] }
  0xfc   : > { %v1273_v43 = vrot.slane %v1271_v37, 4  ;;  %v1276_v49 = vrot.slane %v1274_v38, 5  ;;  %v1287_v51 = vrot.slane %v1285_v39, 4  ;;  %v1290_v52 = vrot.slane %v1288_v40, 5 }
  0xfd   : > { %v3844_v39 = vor.u32 %v4223_v16, %v3843_v15  ;;  %v3550_v16 = vld [vmem:[%s4668_s10 + $0x2c] sm:$0x1] }
  0xfe   : > { %v1277_v60 = vor.u32 %v1276_v49, %v1273_v43  ;;  %v1291_v62 = vor.u32 %v1290_v52, %v1287_v51  ;;  %v3487_v43 = vld [vmem:[%s4668_s10 + $0x148] sm:$0xf]  ;;  %v1302_v49 = vshll.u32 %v3485_v42, 16 }
  0xff   : > { %v1313_v51 = vshrl.u32 %v3487_v43, 16  ;;  %v1316_v52 = vshll.u32 %v3487_v43, 16 }
 0x100   : > { %v1278_v12 = vrot.slane %v1277_v60, 4  ;;  %v1292_v13 = vrot.slane %v1291_v62, 4  ;;  %v1304_v56 = vrot.slane %v1302_v49, 5  ;;  %v3486_v60 = vld [vmem:[%s4668_s10 + $0x144] sm:$0x1] }
 0x101   : > { %v1308_v0 = vshll.u32 %v3486_v60, 16  ;;  %v1315_v2 = vrot.slane %v1313_v51, 4  ;;  %v1318_v5 = vrot.slane %v1316_v52, 5  ;;  %v4162_v49 = vld [vmem:[#allocation2 + $0x40] sm:$0xf0] }
 0x102   : > { %v1283_v18 = vsel %vm4730_vm2, %v1278_v12, %v1282_v61  ;;  %v1297_v19 = vsel %vm4730_vm2, %v1292_v13, %v1296_v7  ;;  %v3488_v61 = vld [vmem:[%s4668_s10 + $0x14c] sm:$0x1] }
 0x103   : > { %1484 = vst [vmem:[#allocation2 + $0x5c] sm:$0xf] %v1283_v18  ;;  %v1322_v6 = vshll.u32 %v3488_v61, 16  ;;  %v1310_v10 = vrot.slane %v1308_v0, 5  ;;  %v1319_v14 = vor.u32 %v1318_v5, %v1315_v2  ;;  %v1653_v18 = vshrl.u32 %v3549_v11, 16 }
 0x104   : > { %v5030_v29 = vpop.f32.mrf.mxu1  ;;  %1485 = vst [vmem:[#allocation2 + $0x80] sm:$0xf] %v1297_v19 }
 0x105   : > { %v1324_v15 = vrot.slane %v1322_v6, 5  ;;  %v3489_v6 = vld [vmem:[%s4668_s10 + $0x150] sm:$0xf] }
 0x106   : > { %v5034_v34 = vpop.f32.mrf.mxu0 }
 0x107   : > { %2967 = vmatmul.bf16.gmra.mxu1 %v3796_v23  ;;  %3016 = vmatmul.bf16.gmra.mxu2 %v3800_v24  ;;  %v1639_v23 = vshrl.u32 %v3547_v63, 16  ;;  %v1642_v24 = vshll.u32 %v3547_v63, 16 }
 0x109   : > { %3065 = vmatmul.bf16.gmra.mxu3 %v3804_v30  ;;  %3114 = vmatmul.bf16.gmra.mxu0 %v3808_v31  ;;  %v1630_v30 = vrot.slane %v1628_v21, 5  ;;  %v1641_v35 = vrot.slane %v1639_v23, 4  ;;  %v1644_v36 = vrot.slane %v1642_v24, 5  ;;  %v3593_v21 = vld [vmem:[#allocation2 + $0x34] sm:$0xf0] }
 0x10a   : > { %v2909_v48 = vpop.f32.mrf.mxu2  ;;  %v4161_v23 = vld [vmem:[#allocation2 + $0x38] sm:$0xf0]  ;;  %v3596_v52 = vor.u32 %v4156_v20, %v3593_v21 }
 0x10b   : > { %v5049_v53 = vadd.f32 %v5045_v46, %v2909_v48  ;;  %v1631_v40 = vor.u32 %v1630_v30, %v1627_v17  ;;  %v1645_v45 = vor.u32 %v1644_v36, %v1641_v35  ;;  %v1299_v48 = vshrl.u32 %v3485_v42, 16  ;;  %v3551_v17 = vld [vmem:[%s4668_s10 + $0x30] sm:$0xf]  ;;  %v3601_v30 = vld [vmem:[#allocation2 + $0x3c] sm:$0xf0] }
 0x10c   : > { %v2919_v54 = vpop.f32.mrf.mxu3  ;;  %v5055_v59 = vpop.f32.mrf.mxu1  ;;  %v1655_v35 = vrot.slane %v1653_v18, 4  ;;  %v3607_v36 = vld [vmem:[#allocation2 + $0x20] sm:$0xf]  ;;  %v1670_v42 = vshll.u32 %v3551_v17, 16 }
 0x10d   : > { %v5053_v58 = vadd.f32 %v5045_v46, %v2919_v54  ;;  %v1632_v50 = vrot.slane %v1631_v40, 4  ;;  %v1646_v54 = vrot.slane %v1645_v45, 4  ;;  %v1301_v55 = vrot.slane %v1299_v48, 4  ;;  %v3530_v45 = vld [vmem:[%s4668_s10 + $0xc0] sm:$0xf] }
 0x10e   : > { %v5059_v1 = vpop.f32.mrf.mxu0  ;;  %v1662_v40 = vshll.u32 %v3550_v16, 16  ;;  %v2890_v48 = vadd.f32 %v5045_v46, %v5034_v34  ;;  %1553 = vst [vmem:[#allocation2 + $0xd0] sm:$0xf] %v3530_v45  ;;  %v3608_v2 = vor.u32 %v4162_v49, %v3607_v36  ;;  %v3554_v49 = vld [vmem:[%s4668_s10 + $0x3c] sm:$0x1] }
 0x10f   : > { %v1637_v57 = vsel %vm4730_vm2, %v1632_v50, %v1636_v41  ;;  %v1651_v62 = vsel %vm4730_vm2, %v1646_v54, %v1650_v47  ;;  %v1305_v63 = vor.u32 %v1304_v56, %v1301_v55  ;;  %v1667_v41 = vshrl.u32 %v3551_v17, 16 }
 0x110   : > { %1838 = vst [vmem:[#allocation2 + $0x68] sm:$0xf] %v1637_v57  ;;  %v3600_v54 = vor.u32 %v4161_v23, %v3599_v22  ;;  %v1672_v56 = vrot.slane %v1670_v42, 5  ;;  %v2892_v36 = vadd.f32 %v5045_v46, %v5059_v1  ;;  %v1681_v42 = vshrl.u32 %v3553_v25, 16  ;;  %v4165_v1 = vld [vmem:[#allocation2 + $0x5c] sm:$0xf] }
 0x111   : > { %1839 = vst [vmem:[#allocation2 + $0x8c] sm:$0xf] %v1651_v62  ;;  %v1306_v9 = vrot.slane %v1305_v63, 4  ;;  %v1669_v55 = vrot.slane %v1667_v41, 4  ;;  %v1664_v63 = vrot.slane %v1662_v40, 5 }
 0x112   : > { %v2911_v26 = vpop.f32.mrf.mxu2 }
 0x113   : > { %v5070_v31 = vadd.f32 %v5045_v46, %v2911_v26  ;;  %v1311_v24 = vsel %vm4730_vm2, %v1306_v9, %v1310_v10  ;;  %v3514_v26 = vld [vmem:[%s4668_s10 + $0x30] sm:$0xf] }
 0x114   : > { %v2921_v32 = vpop.f32.mrf.mxu3  ;;  %v5075_v38 = vpop.f32.mrf.mxu1  ;;  %1486 = vst [vmem:[#allocation2 + $0xa4] sm:$0xf] %v1311_v24  ;;  %v3490_v24 = vld [vmem:[%s4668_s10 + $0x154] sm:$0x1] }
 0x115   : > { %v5073_v37 = vadd.f32 %v5045_v46, %v2921_v32  ;;  %v1320_v32 = vrot.slane %v1319_v14, 4  ;;  %1520 = vst [vmem:[#allocation2 + $0xcc] sm:$0xf] %v3514_v26  ;;  %v1327_v14 = vshrl.u32 %v3489_v6, 16  ;;  %v3492_v26 = vld [vmem:[%s4668_s10 + $0x15c] sm:$0x1] }
 0x116   : > { %v5079_v44 = vpop.f32.mrf.mxu0 }
 0x117   : > { %2972 = vmatmul.bf16.gmra.mxu1 %v3832_v27  ;;  %3021 = vmatmul.bf16.gmra.mxu2 %v3836_v28  ;;  %v3552_v27 = vld [vmem:[%s4668_s10 + $0x34] sm:$0x1]  ;;  %v4157_v28 = vld [vmem:[#allocation2 + $0x1c] sm:$0xf]  ;;  %v1325_v43 = vsel %vm4730_vm2, %v1320_v32, %v1324_v15  ;;  %v1330_v15 = vshll.u32 %v3489_v6, 16  ;;  %v1329_v21 = vrot.slane %v1327_v14, 4 }
 0x118   : > { %v1676_v47 = vshll.u32 %v3552_v27, 16  ;;  %1487 = vst [vmem:[#allocation2 + $0xc8] sm:$0xf] %v1325_v43  ;;  %v3604_v61 = vor.u32 %v4157_v28, %v3601_v30  ;;  %v1336_v30 = vshll.u32 %v3490_v24, 16  ;;  %v4166_v6 = vld [vmem:[#allocation2 + $0x64] sm:$0xf] }
 0x119   : > { %3070 = vmatmul.bf16.gmra.mxu3 %v3840_v33  ;;  %3119 = vmatmul.bf16.gmra.mxu0 %v3844_v39  ;;  %v3529_v33 = vld [vmem:[%s4668_s10 + $0xb8] sm:$0xf]  ;;  %v1656_v39 = vshll.u32 %v3549_v11, 16  ;;  %v1332_v22 = vrot.slane %v1330_v15, 5  ;;  %v1690_v15 = vshll.u32 %v3554_v49, 16 }
 0x11a   : > { %v2914_v4 = vpop.f32.mrf.mxu2  ;;  %1552 = vst [vmem:[#allocation2 + $0xac] sm:$0xf] %v3529_v33  ;;  %v1678_v5 = vrot.slane %v1676_v47, 5  ;;  %v1338_v45 = vrot.slane %v1336_v30, 5 }
 0x11b   : > { %v5088_v7 = vadd.f32 %v5045_v46, %v2914_v4  ;;  %v1658_v50 = vrot.slane %v1656_v39, 5  ;;  %v1673_v4 = vor.u32 %v1672_v56, %v1669_v55  ;;  %v1333_v27 = vor.u32 %v1332_v22, %v1329_v21  ;;  %v3515_v55 = vld [vmem:[%s4668_s10 + $0x38] sm:$0xf]  ;;  %v3516_v56 = vld [vmem:[%s4668_s10 + $0x40] sm:$0xf] }
 0x11c   : > { %v2924_v8 = vpop.f32.mrf.mxu3  ;;  %v5094_v13 = vpop.f32.mrf.mxu1  ;;  %1521 = vst [vmem:[#allocation2 + $0xf0] sm:$0xf] %v3515_v55  ;;  %v4171_v22 = vld [vmem:[#allocation2 + $0x88] sm:$0xf0]  ;;  %v1692_v24 = vrot.slane %v1690_v15, 5 }
 0x11d   : > { %v5092_v12 = vadd.f32 %v5045_v46, %v2924_v8  ;;  %v1659_v62 = vor.u32 %v1658_v50, %v1655_v35  ;;  %v3491_v8 = vld [vmem:[%s4668_s10 + $0x158] sm:$0xf]  ;;  %v1674_v16 = vrot.slane %v1673_v4, 4  ;;  %v1350_v35 = vshll.u32 %v3492_v26, 16  ;;  %v3556_v4 = vld [vmem:[%s4668_s10 + $0x44] sm:$0x1] }
 0x11e   : > { %v5098_v19 = vpop.f32.mrf.mxu0  ;;  %v1341_v17 = vshrl.u32 %v3491_v8, 16  ;;  %v1344_v18 = vshll.u32 %v3491_v8, 16  ;;  %v1334_v41 = vrot.slane %v1333_v27, 4  ;;  %v1684_v50 = vshll.u32 %v3553_v25, 16  ;;  %v3637_v8 = vld [vmem:[#allocation2 + $0x84] sm:$0xf0] }
 0x11f   : > { %v1660_v11 = vrot.slane %v1659_v62, 4  ;;  %v1679_v23 = vsel %vm4730_vm2, %v1674_v16, %v1678_v5  ;;  %v3635_v62 = vld [vmem:[#allocation2 + $0x60] sm:$0xf]  ;;  %v1683_v5 = vrot.slane %v1681_v42, 4  ;;  %1522 = vst [vmem:[#allocation2 + $0x114] sm:$0xf] %v3516_v56  ;;  %v2895_v26 = vadd.f32 %v5045_v46, %v5079_v44 }
 0x120   : > { %1841 = vst [vmem:[#allocation2 + $0xd4] sm:$0xf] %v1679_v23  ;;  %v1343_v32 = vrot.slane %v1341_v17, 4  ;;  %v1346_v33 = vrot.slane %v1344_v18, 5  ;;  %v1686_v14 = vrot.slane %v1684_v50, 5  ;;  %v1704_v25 = vshll.u32 %v3556_v4, 16 }
 0x121   : > { %v1665_v20 = vsel %vm4730_vm2, %v1660_v11, %v1664_v63  ;;  %v4170_v63 = vld [vmem:[#allocation2 + $0x80] sm:$0xf0]  ;;  %v3531_v11 = vld [vmem:[%s4668_s10 + $0xc8] sm:$0xf]  ;;  %v3532_v18 = vld [vmem:[%s4668_s10 + $0xd0] sm:$0xf] }
 0x122   : > { %v2916_v51 = vpop.f32.mrf.mxu2  ;;  %1840 = vst [vmem:[#allocation2 + $0xb0] sm:$0xf] %v1665_v20  ;;  %v1347_v47 = vor.u32 %v1346_v33, %v1343_v32  ;;  %v1687_v23 = vor.u32 %v1686_v14, %v1683_v5 }
 0x123   : > { %v5112_v57 = vadd.f32 %v5045_v46, %v2916_v51  ;;  %1554 = vst [vmem:[#allocation2 + $0xf4] sm:$0xf] %v3531_v11 }
 0x124   : > { %v2926_v60 = vpop.f32.mrf.mxu3  ;;  %v2938_v0 = vpop.f32.mrf.mxu1  ;;  %1555 = vst [vmem:[#allocation2 + $0x118] sm:$0xf] %v3532_v18  ;;  %v3557_v18 = vld [vmem:[%s4668_s10 + $0x50] sm:$0xf] }
 0x125   : > { %v5115_v34 = vadd.f32 %v5045_v46, %v2926_v60  ;;  %v2939_v9 = vadd.f32 %v2938_v0, %v2890_v48  ;;  %v1352_v48 = vrot.slane %v1350_v35, 5  ;;  %v3555_v60 = vld [vmem:[%s4668_s10 + $0x40] sm:$0xf]  ;;  %v1339_v0 = vsel %vm4730_vm2, %v1334_v41, %v1338_v45  ;;  %v3493_v45 = vld [vmem:[%s4668_s10 + $0x168] sm:$0xf] }
 0x126   : > { %v3085_v10 = vpop.f32.mrf.mxu0  ;;  %1488 = vst [vmem:[#allocation2 + $0xec] sm:$0xf] %v1339_v0  ;;  %v1695_v20 = vshrl.u32 %v3555_v60, 16  ;;  %v1698_v21 = vshll.u32 %v3555_v60, 16  ;;  %v3636_v35 = vor.u32 %v4170_v63, %v3635_v62  ;;  %v1358_v55 = vshll.u32 %v3493_v45, 16 }
 0x127   : > { %3133 = vmatmul.bf16.vlgmr.msra.gmra.mxu1 %v3596_v52  ;;  %3182 = vmatmul.bf16.vlgmr.msra.gmra.mxu2 %v3600_v54  ;;  %v3494_v63 = vld [vmem:[%s4668_s10 + $0x16c] sm:$0x1]  ;;  %v3496_v0 = vld [vmem:[%s4668_s10 + $0x174] sm:$0x1] }
 0x128   : > { %v1364_v4 = vshll.u32 %v3494_v63, 16 }
 0x129   : > { %3231 = vmatmul.bf16.vlgmr.msra.gmra.mxu3 %v3604_v61  ;;  %3280 = vmatmul.bf16.vlgmr.msra.gmra.mxu0 %v3608_v2  ;;  %v3629_v61 = vld [vmem:[#allocation2 + $0x7c] sm:$0xf0]  ;;  %v1348_v2 = vrot.slane %v1347_v47, 4  ;;  %v3495_v47 = vld [vmem:[%s4668_s10 + $0x170] sm:$0xf] }
 0x12a   : > { %v2987_v28 = vpop.f32.mrf.mxu2  ;;  %v3632_v33 = vor.u32 %v4165_v1, %v3629_v61  ;;  %v1369_v60 = vshrl.u32 %v3495_v47, 16  ;;  %v1372_v1 = vshll.u32 %v3495_v47, 16  ;;  %v3679_v47 = vld [vmem:[#allocation2 + $0xb0] sm:$0xf] }
 0x12b   : > { %v2988_v39 = vadd.f32 %v2987_v28, %v2939_v9  ;;  %v3643_v9 = vld [vmem:[#allocation2 + $0x68] sm:$0xf]  ;;  %v1353_v17 = vsel %vm4730_vm2, %v1348_v2, %v1352_v48  ;;  %v1700_v28 = vrot.slane %v1698_v21, 5  ;;  %v1360_v2 = vrot.slane %v1358_v55, 5 }
 0x12c   : > { %v3036_v40 = vpop.f32.mrf.mxu3  ;;  %v2940_v43 = vpop.f32.mrf.mxu1  ;;  %1489 = vst [vmem:[#allocation2 + $0x110] sm:$0xf] %v1353_v17  ;;  %v3644_v41 = vor.u32 %v4171_v22, %v3643_v9  ;;  %v1378_v9 = vshll.u32 %v3496_v0, 16  ;;  %v1366_v17 = vrot.slane %v1364_v4, 5  ;;  %v3534_v55 = vld [vmem:[%s4668_s10 + $0xe8] sm:$0xf]  ;;  %v2900_v0 = vadd.f32 %v5045_v46, %v5030_v29 }
 0x12d   : > { %v3037_v51 = vadd.f32 %v3036_v40, %v2988_v39  ;;  %v2941_v52 = vadd.f32 %v2940_v43, %v2892_v36  ;;  %v1688_v36 = vrot.slane %v1687_v23, 4  ;;  %v3640_v40 = vor.u32 %v4166_v6, %v3637_v8  ;;  %v3558_v23 = vld [vmem:[%s4668_s10 + $0x54] sm:$0x1]  ;;  %1557 = vst [vmem:[#allocation2 + $0x160] sm:$0xf] %v3534_v55 }
 0x12e   : > { %v3087_v54 = vpop.f32.mrf.mxu0  ;;  %v1706_v43 = vrot.slane %v1704_v25, 5  ;;  %v1371_v6 = vrot.slane %v1369_v60, 4  ;;  %v1374_v8 = vrot.slane %v1372_v1, 5  ;;  %v1380_v22 = vrot.slane %v1378_v9, 5  ;;  %v3499_v29 = vld [vmem:[%s4668_s10 + $0x180] sm:$0xf] }
 0x12f   : > { %v5136_v16 = vadd.f32 %v3085_v10, %v3037_v51  ;;  %v1697_v10 = vrot.slane %v1695_v20, 4  ;;  %v1693_v50 = vsel %vm4730_vm2, %v1688_v36, %v1692_v24  ;;  %v1355_v51 = vshrl.u32 %v3493_v45, 16  ;;  %v3559_v24 = vld [vmem:[%s4668_s10 + $0x58] sm:$0xf]  ;;  %v4174_v36 = vld [vmem:[#allocation2 + $0xa4] sm:$0xf] }
 0x130   : > { %1842 = vst [vmem:[#allocation2 + $0xf8] sm:$0xf] %v1693_v50  ;;  %v1375_v21 = vor.u32 %v1374_v8, %v1371_v6  ;;  %v1709_v25 = vshrl.u32 %v3557_v18, 16  ;;  %v3673_v45 = vld [vmem:[#allocation2 + $0xcc] sm:$0xf0]  ;;  %v1718_v60 = vshll.u32 %v3558_v23, 16 }
 0x131   : > { %v1701_v42 = vor.u32 %v1700_v28, %v1697_v10  ;;  %v1357_v56 = vrot.slane %v1355_v51, 4  ;;  %v3671_v28 = vld [vmem:[#allocation2 + $0xa8] sm:$0xf]  ;;  %v3533_v50 = vld [vmem:[%s4668_s10 + $0xe0] sm:$0xf]  ;;  %v1723_v1 = vshrl.u32 %v3559_v24, 16 }
 0x132   : > { %v2989_v27 = vpop.f32.mrf.mxu2  ;;  %1556 = vst [vmem:[#allocation2 + $0x13c] sm:$0xf] %v3533_v50 }
 0x133   : > { %v2990_v30 = vadd.f32 %v2989_v27, %v2941_v52  ;;  %v1702_v52 = vrot.slane %v1701_v42, 4  ;;  %v1361_v15 = vor.u32 %v1360_v2, %v1357_v56  ;;  %v1711_v42 = vrot.slane %v1709_v25, 4 }
 0x134   : > { %v3038_v32 = vpop.f32.mrf.mxu3  ;;  %v2943_v39 = vpop.f32.mrf.mxu1 }
 0x135   : > { %v3039_v44 = vadd.f32 %v3038_v32, %v2990_v30  ;;  %v2944_v48 = vadd.f32 %v2943_v39, %v2895_v26  ;;  %v1707_v62 = vsel %vm4730_vm2, %v1702_v52, %v1706_v43  ;;  %v1362_v30 = vrot.slane %v1361_v15, 4  ;;  %v3517_v32 = vld [vmem:[%s4668_s10 + $0x50] sm:$0xf]  ;;  %v3665_v39 = vld [vmem:[#allocation2 + $0xc4] sm:$0xf0] }
 0x136   : > { %v3090_v49 = vpop.f32.mrf.mxu0  ;;  %1843 = vst [vmem:[#allocation2 + $0x11c] sm:$0xf] %v1707_v62  ;;  %v4175_v43 = vld [vmem:[#allocation2 + $0xac] sm:$0xf]  ;;  %v1726_v62 = vshll.u32 %v3559_v24, 16  ;;  %v3668_v9 = vor.u32 %v4174_v36, %v3665_v39 }
 0x137   : > { %3138 = vmatmul.bf16.gmra.mxu1 %v3632_v33  ;;  %3187 = vmatmul.bf16.gmra.mxu2 %v3636_v35  ;;  %v5147_v61 = vadd.f32 %v3087_v54, %v3039_v44  ;;  %v2897_v54 = vadd.f32 %v5045_v46, %v5098_v19  ;;  %v4179_v19 = vld [vmem:[#allocation2 + $0xc8] sm:$0xf0]  ;;  %v3560_v33 = vld [vmem:[%s4668_s10 + $0x5c] sm:$0x1]  ;;  %v1712_v35 = vshll.u32 %v3557_v18, 16  ;;  %v3676_v15 = vor.u32 %v4175_v43, %v3673_v45 }
 0x138   : > { %1523 = vst [vmem:[#allocation2 + $0x138] sm:$0xf] %v3517_v32  ;;  %v4180_v44 = vld [vmem:[#allocation2 + $0xd0] sm:$0xf0]  ;;  %v1732_v63 = vshll.u32 %v3560_v33, 16  ;;  %v3672_v4 = vor.u32 %v4179_v19, %v3671_v28  ;;  %v1397_v19 = vshrl.u32 %v3499_v29, 16 }
 0x139   : > { %3236 = vmatmul.bf16.gmra.mxu3 %v3640_v40  ;;  %3285 = vmatmul.bf16.gmra.mxu0 %v3644_v41  ;;  %v1376_v40 = vrot.slane %v1375_v21, 4  ;;  %v3518_v41 = vld [vmem:[%s4668_s10 + $0x58] sm:$0xf]  ;;  %v1714_v56 = vrot.slane %v1712_v35, 5  ;;  %v3498_v36 = vld [vmem:[%s4668_s10 + $0x17c] sm:$0x1] }
 0x13a   : > { %v2992_v5 = vpop.f32.mrf.mxu2  ;;  %1524 = vst [vmem:[#allocation2 + $0x15c] sm:$0xf] %v3518_v41  ;;  %v3497_v21 = vld [vmem:[%s4668_s10 + $0x178] sm:$0xf]  ;;  %v3561_v43 = vld [vmem:[%s4668_s10 + $0x60] sm:$0xf] }
 0x13b   : > { %v2993_v11 = vadd.f32 %v2992_v5, %v2944_v48  ;;  %v1367_v48 = vsel %vm4730_vm2, %v1362_v30, %v1366_v17  ;;  %v1381_v52 = vsel %vm4730_vm2, %v1376_v40, %v1380_v22  ;;  %v1720_v5 = vrot.slane %v1718_v60, 5  ;;  %v3500_v40 = vld [vmem:[%s4668_s10 + $0x184] sm:$0x1] }
 0x13c   : > { %v3041_v14 = vpop.f32.mrf.mxu3  ;;  %v2945_v20 = vpop.f32.mrf.mxu1  ;;  %1490 = vst [vmem:[#allocation2 + $0x134] sm:$0xf] %v1367_v48  ;;  %v3680_v17 = vor.u32 %v4180_v44, %v3679_v47  ;;  %v1386_v28 = vshll.u32 %v3497_v21, 16  ;;  %v1400_v30 = vshll.u32 %v3499_v29, 16  ;;  %v1399_v47 = vrot.slane %v1397_v19, 4 }
 0x13d   : > { %v3042_v26 = vadd.f32 %v3041_v14, %v2993_v11  ;;  %v2946_v27 = vadd.f32 %v2945_v20, %v2897_v54  ;;  %1491 = vst [vmem:[#allocation2 + $0x158] sm:$0xf] %v1381_v52  ;;  %v1725_v54 = vrot.slane %v1723_v1, 4  ;;  %v1728_v11 = vrot.slane %v1726_v62, 5  ;;  %v3715_v29 = vld [vmem:[#allocation2 + $0xf8] sm:$0xf] }
 0x13e   : > { %v5158_v10 = vpop.f32.mrf.mxu0  ;;  %v1734_v20 = vrot.slane %v1732_v63, 5  ;;  %v1388_v41 = vrot.slane %v1386_v28, 5  ;;  %v1402_v44 = vrot.slane %v1400_v30, 5  ;;  %v1406_v62 = vshll.u32 %v3500_v40, 16  ;;  %v3563_v63 = vld [vmem:[%s4668_s10 + $0x68] sm:$0xf] }
 0x13f   : > { %v5166_v51 = vadd.f32 %v3090_v49, %v3042_v26  ;;  %v1715_v49 = vor.u32 %v1714_v56, %v1711_v42  ;;  %v1729_v25 = vor.u32 %v1728_v11, %v1725_v54  ;;  %v1383_v26 = vshrl.u32 %v3497_v21, 16  ;;  %v3562_v56 = vld [vmem:[%s4668_s10 + $0x64] sm:$0x1]  ;;  %v3520_v54 = vld [vmem:[%s4668_s10 + $0x68] sm:$0xf] }
 0x140   : > { %v1392_v42 = vshll.u32 %v3498_v36, 16  ;;  %v1403_v1 = vor.u32 %v1402_v44, %v1399_v47  ;;  %v4183_v11 = vld [vmem:[#allocation2 + $0xec] sm:$0xf]  ;;  %v3709_v21 = vld [vmem:[#allocation2 + $0x114] sm:$0xf0]  ;;  %v1751_v36 = vshrl.u32 %v3563_v63, 16 }
 0x141   : > { %v1716_v18 = vrot.slane %v1715_v49, 4  ;;  %v1730_v32 = vrot.slane %v1729_v25, 4  ;;  %v1385_v33 = vrot.slane %v1383_v26, 4  ;;  %1526 = vst [vmem:[#allocation2 + $0x1a4] sm:$0xf] %v3520_v54 }
 0x142   : > { %v2994_v2 = vpop.f32.mrf.mxu2  ;;  %v1394_v55 = vrot.slane %v1392_v42, 5  ;;  %v3564_v25 = vld [vmem:[%s4668_s10 + $0x6c] sm:$0x1]  ;;  %v3536_v28 = vld [vmem:[%s4668_s10 + $0xf8] sm:$0xf] }
 0x143   : > { %v2995_v6 = vadd.f32 %v2994_v2, %v2946_v27  ;;  %v1721_v27 = vsel %vm4730_vm2, %v1716_v18, %v1720_v5  ;;  %v1735_v39 = vsel %vm4730_vm2, %v1730_v32, %v1734_v20  ;;  %v1389_v52 = vor.u32 %v1388_v41, %v1385_v33  ;;  %v4184_v20 = vld [vmem:[#allocation2 + $0xf4] sm:$0xf]  ;;  %v4189_v33 = vld [vmem:[#allocation2 + $0x118] sm:$0xf0]  ;;  %1559 = vst [vmem:[#allocation2 + $0x1a8] sm:$0xf] %v3536_v28 }
 0x144   : > { %v3043_v8 = vpop.f32.mrf.mxu3  ;;  %v2948_v14 = vpop.f32.mrf.mxu1  ;;  %1844 = vst [vmem:[#allocation2 + $0x140] sm:$0xf] %v1721_v27  ;;  %v1740_v2 = vshll.u32 %v3561_v43, 16  ;;  %v1746_v18 = vshll.u32 %v3562_v56, 16  ;;  %v2905_v32 = vadd.f32 %v5045_v46, %v5075_v38  ;;  %v3712_v38 = vor.u32 %v4184_v20, %v3709_v21  ;;  %v3565_v21 = vld [vmem:[%s4668_s10 + $0x70] sm:$0xf] }
 0x145   : > { %v3044_v22 = vadd.f32 %v3043_v8, %v2995_v6  ;;  %v2949_v23 = vadd.f32 %v2948_v14, %v2900_v0  ;;  %1845 = vst [vmem:[#allocation2 + $0x164] sm:$0xf] %v1735_v39  ;;  %v1737_v0 = vshrl.u32 %v3561_v43, 16  ;;  %v3707_v6 = vld [vmem:[#allocation2 + $0xf0] sm:$0xf]  ;;  %v1390_v8 = vrot.slane %v1389_v52, 4 }
 0x146   : > { %v3095_v24 = vpop.f32.mrf.mxu0  ;;  %v3701_v14 = vld [vmem:[#allocation2 + $0x10c] sm:$0xf0]  ;;  %v1742_v30 = vrot.slane %v1740_v2, 5  ;;  %v1754_v39 = vshll.u32 %v3563_v63, 16  ;;  %v1748_v42 = vrot.slane %v1746_v18, 5  ;;  %v1760_v43 = vshll.u32 %v3564_v25, 16 }
 0x147   : > { %3143 = vmatmul.bf16.gmra.mxu1 %v3668_v9  ;;  %3192 = vmatmul.bf16.gmra.mxu2 %v3672_v4  ;;  %v5178_v35 = vadd.f32 %v5158_v10, %v3044_v22  ;;  %v2902_v10 = vadd.f32 %v5045_v46, %v5055_v59  ;;  %v4188_v59 = vld [vmem:[#allocation2 + $0x110] sm:$0xf0]  ;;  %v3519_v9 = vld [vmem:[%s4668_s10 + $0x60] sm:$0xf]  ;;  %v1395_v22 = vsel %vm4730_vm2, %v1390_v8, %v1394_v55  ;;  %v1739_v19 = vrot.slane %v1737_v0, 4 }
 0x148   : > { %1525 = vst [vmem:[#allocation2 + $0x180] sm:$0xf] %v3519_v9  ;;  %v3708_v41 = vor.u32 %v4188_v59, %v3707_v6  ;;  %v3704_v44 = vor.u32 %v4183_v11, %v3701_v14  ;;  %v3716_v52 = vor.u32 %v4189_v33, %v3715_v29  ;;  %v1762_v56 = vrot.slane %v1760_v43, 5  ;;  %v3502_v14 = vld [vmem:[%s4668_s10 + $0x18c] sm:$0x1] }
 0x149   : > { %3241 = vmatmul.bf16.gmra.mxu3 %v3676_v15  ;;  %3290 = vmatmul.bf16.gmra.mxu0 %v3680_v17  ;;  %v1404_v15 = vrot.slane %v1403_v1, 4  ;;  %v1408_v17 = vrot.slane %v1406_v62, 5  ;;  %1492 = vst [vmem:[#allocation2 + $0x17c] sm:$0xf] %v1395_v22  ;;  %v3503_v1 = vld [vmem:[%s4668_s10 + $0x190] sm:$0xf] }
 0x14a   : > { %v2997_v45 = vpop.f32.mrf.mxu2  ;;  %v1425_v59 = vshrl.u32 %v3503_v1, 16  ;;  %v1428_v8 = vshll.u32 %v3503_v1, 16  ;;  %v1420_v20 = vshll.u32 %v3502_v14, 16 }
 0x14b   : > { %v2998_v48 = vadd.f32 %v2997_v45, %v2949_v23  ;;  %v3535_v23 = vld [vmem:[%s4668_s10 + $0xf0] sm:$0xf]  ;;  %v1409_v27 = vsel %vm4730_vm2, %v1404_v15, %v1408_v17  ;;  %v3504_v17 = vld [vmem:[%s4668_s10 + $0x194] sm:$0x1] }
 0x14c   : > { %v3046_v50 = vpop.f32.mrf.mxu3  ;;  %v2950_v60 = vpop.f32.mrf.mxu1  ;;  %1493 = vst [vmem:[#allocation2 + $0x1a0] sm:$0xf] %v1409_v27  ;;  %v1427_v22 = vrot.slane %v1425_v59, 4 }
 0x14d   : > { %v3047_v4 = vadd.f32 %v3046_v50, %v2998_v48  ;;  %v2951_v49 = vadd.f32 %v2950_v60, %v2902_v10  ;;  %1558 = vst [vmem:[#allocation2 + $0x184] sm:$0xf] %v3535_v23  ;;  %v1753_v10 = vrot.slane %v1751_v36, 4  ;;  %v1756_v48 = vrot.slane %v1754_v39, 5  ;;  %v3501_v60 = vld [vmem:[%s4668_s10 + $0x188] sm:$0xf] }
 0x14e   : > { %v5189_v5 = vpop.f32.mrf.mxu0  ;;  %v1414_v6 = vshll.u32 %v3501_v60, 16  ;;  %v1430_v23 = vrot.slane %v1428_v8, 5  ;;  %v1434_v36 = vshll.u32 %v3504_v17, 16  ;;  %v3567_v39 = vld [vmem:[%s4668_s10 + $0x78] sm:$0xf] }
 0x14f   : > { %v5197_v26 = vadd.f32 %v3095_v24, %v3047_v4  ;;  %v1743_v24 = vor.u32 %v1742_v30, %v1739_v19  ;;  %v1757_v2 = vor.u32 %v1756_v48, %v1753_v10  ;;  %v1411_v4 = vshrl.u32 %v3501_v60, 16  ;;  %v3566_v30 = vld [vmem:[%s4668_s10 + $0x74] sm:$0x1]  ;;  %v3737_v48 = vld [vmem:[#allocation2 + $0x154] sm:$0xf0] }
 0x150   : > { %v1416_v18 = vrot.slane %v1414_v6, 5  ;;  %v1422_v19 = vrot.slane %v1420_v20, 5  ;;  %v1431_v33 = vor.u32 %v1430_v23, %v1427_v22  ;;  %v4192_v10 = vld [vmem:[#allocation2 + $0x134] sm:$0xf]  ;;  %v3751_v60 = vld [vmem:[#allocation2 + $0x140] sm:$0xf] }
 0x151   : > { %v1744_v55 = vrot.slane %v1743_v24, 4  ;;  %v1758_v9 = vrot.slane %v1757_v2, 4  ;;  %v1413_v54 = vrot.slane %v1411_v4, 4  ;;  %v4198_v8 = vld [vmem:[#allocation2 + $0x160] sm:$0xf0] }
 0x152   : > { %v2999_v40 = vpop.f32.mrf.mxu2 }
 0x153   : > { %v3000_v45 = vadd.f32 %v2999_v40, %v2951_v49  ;;  %v1749_v49 = vsel %vm4730_vm2, %v1744_v55, %v1748_v42  ;;  %v1763_v15 = vsel %vm4730_vm2, %v1758_v9, %v1762_v56  ;;  %v1417_v28 = vor.u32 %v1416_v18, %v1413_v54  ;;  %v4193_v55 = vld [vmem:[#allocation2 + $0x13c] sm:$0xf]  ;;  %v3745_v56 = vld [vmem:[#allocation2 + $0x15c] sm:$0xf0] }
 0x154   : > { %v3048_v47 = vpop.f32.mrf.mxu3  ;;  %v2953_v50 = vpop.f32.mrf.mxu1  ;;  %1846 = vst [vmem:[#allocation2 + $0x188] sm:$0xf] %v1749_v49  ;;  %v1765_v40 = vshrl.u32 %v3565_v21, 16  ;;  %v3538_v49 = vld [vmem:[%s4668_s10 + $0x108] sm:$0xf]  ;;  %v1779_v9 = vshrl.u32 %v3567_v39, 16 }
 0x155   : > { %v3049_v62 = vadd.f32 %v3048_v47, %v3000_v45  ;;  %v2954_v63 = vadd.f32 %v2953_v50, %v2905_v32  ;;  %1847 = vst [vmem:[#allocation2 + $0x1ac] sm:$0xf] %v1763_v15  ;;  %v3743_v45 = vld [vmem:[#allocation2 + $0x138] sm:$0xf]  ;;  %v4197_v47 = vld [vmem:[#allocation2 + $0x158] sm:$0xf0] }
 0x156   : > { %v3100_v0 = vpop.f32.mrf.mxu0  ;;  %v1432_v50 = vrot.slane %v1431_v33, 4  ;;  %v1767_v6 = vrot.slane %v1765_v40, 4  ;;  %v1782_v54 = vshll.u32 %v3567_v39, 16  ;;  %v3744_v15 = vor.u32 %v4197_v47, %v3743_v45  ;;  %1561 = vst [vmem:[#allocation2 + $0x1f0] sm:$0xf] %v3538_v49 }
 0x157   : > { %3148 = vmatmul.bf16.gmra.mxu1 %v3704_v44  ;;  %3197 = vmatmul.bf16.gmra.mxu2 %v3708_v41  ;;  %v5209_v11 = vadd.f32 %v5189_v5, %v3049_v62  ;;  %v2907_v5 = vadd.f32 %v5045_v46, %v5094_v13  ;;  %v1768_v41 = vshll.u32 %v3565_v21, 16  ;;  %v1418_v46 = vrot.slane %v1417_v28, 4  ;;  %v3521_v13 = vld [vmem:[%s4668_s10 + $0x70] sm:$0xf]  ;;  %v3522_v44 = vld [vmem:[%s4668_s10 + $0x78] sm:$0xf] }
 0x158   : > { %1527 = vst [vmem:[#allocation2 + $0x1c8] sm:$0xf] %v3521_v13  ;;  %v3537_v62 = vld [vmem:[%s4668_s10 + $0x100] sm:$0xf]  ;;  %v1781_v22 = vrot.slane %v1779_v9, 4  ;;  %v1784_v23 = vrot.slane %v1782_v54, 5 }
 0x159   : > { %3246 = vmatmul.bf16.gmra.mxu3 %v3712_v38  ;;  %3295 = vmatmul.bf16.gmra.mxu0 %v3716_v52  ;;  %v1436_v38 = vrot.slane %v1434_v36, 5  ;;  %v1774_v52 = vshll.u32 %v3566_v30, 16  ;;  %v1423_v1 = vsel %vm4730_vm2, %v1418_v46, %v1422_v19  ;;  %1528 = vst [vmem:[#allocation2 + $0x1ec] sm:$0xf] %v3522_v44  ;;  %v1770_v59 = vrot.slane %v1768_v41, 5 }
 0x15a   : > { %v3002_v29 = vpop.f32.mrf.mxu2  ;;  %1494 = vst [vmem:[#allocation2 + $0x1c4] sm:$0xf] %v1423_v1  ;;  %v3505_v30 = vld [vmem:[%s4668_s10 + $0x198] sm:$0xf]  ;;  %v1785_v40 = vor.u32 %v1784_v23, %v1781_v22  ;;  %v4201_v22 = vld [vmem:[#allocation2 + $0x17c] sm:$0xf] }
 0x15b   : > { %v3003_v25 = vadd.f32 %v3002_v29, %v2954_v63  ;;  %v3568_v63 = vld [vmem:[%s4668_s10 + $0x7c] sm:$0x1]  ;;  %v1437_v4 = vsel %vm4730_vm2, %v1432_v50, %v1436_v38  ;;  %1560 = vst [vmem:[#allocation2 + $0x1cc] sm:$0xf] %v3537_v62  ;;  %v1771_v17 = vor.u32 %v1770_v59, %v1767_v6  ;;  %v1776_v18 = vrot.slane %v1774_v52, 5 }
 0x15c   : > { %v3051_v27 = vpop.f32.mrf.mxu3  ;;  %v2955_v32 = vpop.f32.mrf.mxu1  ;;  %1495 = vst [vmem:[#allocation2 + $0x1e8] sm:$0xf] %v1437_v4  ;;  %v3740_v29 = vor.u32 %v4192_v10, %v3737_v48  ;;  %v1439_v41 = vshrl.u32 %v3505_v30, 16  ;;  %v1786_v46 = vrot.slane %v1785_v40, 4  ;;  %v3508_v48 = vld [vmem:[%s4668_s10 + $0x1a4] sm:$0x1] }
 0x15d   : > { %v3052_v24 = vadd.f32 %v3051_v27, %v3003_v25  ;;  %v2956_v42 = vadd.f32 %v2955_v32, %v2907_v5  ;;  %v3748_v25 = vor.u32 %v4193_v55, %v3745_v56  ;;  %v3752_v27 = vor.u32 %v4198_v8, %v3751_v60  ;;  %v3507_v32 = vld [vmem:[%s4668_s10 + $0x1a0] sm:$0xf]  ;;  %v3570_v4 = vld [vmem:[%s4668_s10 + $0x84] sm:$0x1]  ;;  %v3571_v8 = vld [vmem:[%s4668_s10 + $0x88] sm:$0xf] }
 0x15e   : > { %v3102_v43 = vpop.f32.mrf.mxu0  ;;  %v1772_v28 = vrot.slane %v1771_v17, 4  ;;  %v1453_v45 = vshrl.u32 %v3507_v32, 16  ;;  %v1456_v47 = vshll.u32 %v3507_v32, 16  ;;  %v1441_v13 = vrot.slane %v1439_v41, 4  ;;  %v3569_v52 = vld [vmem:[%s4668_s10 + $0x80] sm:$0xf] }
 0x15f   : > { %v5226_v2 = vadd.f32 %v3100_v0, %v3052_v24  ;;  %v1788_v0 = vshll.u32 %v3568_v63, 16  ;;  %v1462_v59 = vshll.u32 %v3508_v48, 16  ;;  %v1793_v9 = vshrl.u32 %v3569_v52, 16  ;;  %v3773_v23 = vld [vmem:[#allocation2 + $0x19c] sm:$0xf0] }
 0x160   : > { %v1777_v24 = vsel %vm4730_vm2, %v1772_v28, %v1776_v18  ;;  %v1455_v56 = vrot.slane %v1453_v45, 4  ;;  %v1458_v60 = vrot.slane %v1456_v47, 5  ;;  %v1796_v54 = vshll.u32 %v3569_v52, 16  ;;  %v3779_v18 = vld [vmem:[#allocation2 + $0x180] sm:$0xf] }
 0x161   : > { %v1790_v19 = vrot.slane %v1788_v0, 5  ;;  %1848 = vst [vmem:[#allocation2 + $0x1d0] sm:$0xf] %v1777_v24  ;;  %v4206_v0 = vld [vmem:[#allocation2 + $0x1a0] sm:$0xf0]  ;;  %v1795_v24 = vrot.slane %v1793_v9, 4  ;;  %v3776_v52 = vor.u32 %v4201_v22, %v3773_v23 }
 0x162   : > { %v3004_v14 = vpop.f32.mrf.mxu2  ;;  %v1459_v6 = vor.u32 %v1458_v60, %v1455_v56  ;;  %v4202_v28 = vld [vmem:[#allocation2 + $0x184] sm:$0xf]  ;;  %v3539_v32 = vld [vmem:[%s4668_s10 + $0x110] sm:$0xf]  ;;  %v3540_v41 = vld [vmem:[%s4668_s10 + $0x118] sm:$0xf] }
 0x163   : > { %v3005_v20 = vadd.f32 %v3004_v14, %v2956_v42  ;;  %v1442_v42 = vshll.u32 %v3505_v30, 16  ;;  %v1791_v10 = vsel %vm4730_vm2, %v1786_v46, %v1790_v19  ;;  %v3781_v19 = vld [vmem:[#allocation2 + $0x1a4] sm:$0xf0]  ;;  %v4207_v45 = vld [vmem:[#allocation2 + $0x1a8] sm:$0xf0]  ;;  %v1807_v47 = vshrl.u32 %v3571_v8, 16 }
 0x164   : > { %v3053_v21 = vpop.f32.mrf.mxu3  ;;  %v2958_v5 = vpop.f32.mrf.mxu1  ;;  %1849 = vst [vmem:[#allocation2 + $0x1f4] sm:$0xf] %v1791_v10  ;;  %v3787_v30 = vld [vmem:[#allocation2 + $0x188] sm:$0xf]  ;;  %v1810_v46 = vshll.u32 %v3571_v8, 16 }
 0x165   : > { %v3054_v33 = vadd.f32 %v3053_v21, %v3005_v20  ;;  %v2959_v36 = vadd.f32 %v2958_v5, %v5049_v53  ;;  %v3506_v53 = vld [vmem:[%s4668_s10 + $0x19c] sm:$0x1]  ;;  %v1444_v50 = vrot.slane %v1442_v42, 5  ;;  %v3523_v21 = vld [vmem:[%s4668_s10 + $0x80] sm:$0xf]  ;;  %v1460_v5 = vrot.slane %v1459_v6, 4 }
 0x166   : > { %v3105_v39 = vpop.f32.mrf.mxu0  ;;  %v1448_v38 = vshll.u32 %v3506_v53, 16  ;;  %1529 = vst [vmem:[#allocation2 + $0x210] sm:$0xf] %v3523_v21  ;;  %v1798_v42 = vrot.slane %v1796_v54, 5  ;;  %v3780_v53 = vor.u32 %v4206_v0, %v3779_v18  ;;  %v1812_v56 = vrot.slane %v1810_v46, 5 }
 0x167   : > { %3153 = vmatmul.bf16.gmra.mxu1 %v3740_v29  ;;  %3202 = vmatmul.bf16.gmra.mxu2 %v3744_v15  ;;  %v5236_v44 = vadd.f32 %v3102_v43, %v3054_v33  ;;  %v1445_v43 = vor.u32 %v1444_v50, %v1441_v13  ;;  %v3524_v29 = vld [vmem:[%s4668_s10 + $0x88] sm:$0xf]  ;;  %v3572_v33 = vld [vmem:[%s4668_s10 + $0x8c] sm:$0x1]  ;;  %1562 = vst [vmem:[#allocation2 + $0x214] sm:$0xf] %v3539_v32 }
 0x168   : > { %v1450_v63 = vrot.slane %v1448_v38, 5  ;;  %1530 = vst [vmem:[#allocation2 + $0x234] sm:$0xf] %v3524_v29  ;;  %v1799_v10 = vor.u32 %v1798_v42, %v1795_v24  ;;  %v1816_v50 = vshll.u32 %v3572_v33, 16  ;;  %v3815_v22 = vld [vmem:[#allocation2 + $0x1c8] sm:$0xf] }
 0x169   : > { %3251 = vmatmul.bf16.gmra.mxu3 %v3748_v25  ;;  %3300 = vmatmul.bf16.gmra.mxu0 %v3752_v27  ;;  %v1446_v20 = vrot.slane %v1445_v43, 4  ;;  %v1464_v25 = vrot.slane %v1462_v59, 5  ;;  %v1802_v27 = vshll.u32 %v3570_v4, 16  ;;  %1563 = vst [vmem:[#allocation2 + $0x238] sm:$0xf] %v3540_v41  ;;  %s3428_s10 = sshll.u32 %s4662_s6, 7 }
 0x16a   : > { %v3007_v55 = vpop.f32.mrf.mxu2  ;;  %v1800_v43 = vrot.slane %v1799_v10, 4  ;;  %v1818_v59 = vrot.slane %v1816_v50, 5  ;;  %v4215_v23 = vld [vmem:[#allocation2 + $0x1e8] sm:$0xf0]  ;;  %s5283_s8 = scalar_lea.vmem [#allocation4], %s3428_s10 }
 0x16b   : > { %v3008_v1 = vadd.f32 %v3007_v55, %v2959_v36  ;;  %v1465_v40 = vsel %vm4730_vm2, %v1460_v5, %v1464_v25  ;;  %v1804_v48 = vrot.slane %v1802_v27, 5  ;;  %v1809_v55 = vrot.slane %v1807_v47, 4  ;;  %v3809_v25 = vld [vmem:[#allocation2 + $0x1e4] sm:$0xf0]  ;;  %v4211_v27 = vld [vmem:[#allocation2 + $0x1cc] sm:$0xf] }
 0x16c   : > { %v3056_v62 = vpop.f32.mrf.mxu3  ;;  %v2960_v49 = vpop.f32.mrf.mxu1  ;;  %1497 = vst [vmem:[#allocation2 + $0x230] sm:$0xf] %v1465_v40  ;;  %v4216_v3 = vld [vmem:[#allocation2 + $0x1f0] sm:$0xf0]  ;;  %v3816_v40 = vor.u32 %v4215_v23, %v3815_v22  ;;  %s3350_s20 = sshll.u32 %s5283_s8, 4  ;;  %s3351_s20 = int_to_ptr.vmem [resolvable:$true] %s3350_s20 }
 0x16d   : > { %v3057_v14 = vadd.f32 %v3056_v62, %v3008_v1  ;;  %v2961_v15 = vadd.f32 %v2960_v49, %v5070_v31  ;;  %v1451_v31 = vsel %vm4730_vm2, %v1446_v20, %v1450_v63  ;;  %v3784_v1 = vor.u32 %v4202_v28, %v3781_v19  ;;  %v3817_v28 = vld [vmem:[#allocation2 + $0x1ec] sm:$0xf0] }
 0x16e   : > { %v3107_v17 = vpop.f32.mrf.mxu0  ;;  %1496 = vst [vmem:[#allocation2 + $0x20c] sm:$0xf] %v1451_v31  ;;  %v3788_v62 = vor.u32 %v4207_v45, %v3787_v30  ;;  %v1813_v6 = vor.u32 %v1812_v56, %v1809_v55  ;;  %v1805_v8 = vsel %vm4730_vm2, %v1800_v43, %v1804_v48  ;;  %v3823_v19 = vld [vmem:[#allocation2 + $0x1d0] sm:$0xf]  ;;  %v3820_v24 = vor.u32 %v4211_v27, %v3817_v28 }
 0x16f   : > { %v5252_v36 = vadd.f32 %v3105_v39, %v3057_v14  ;;  %1850 = vst [vmem:[#allocation2 + $0x218] sm:$0xf] %v1805_v8  ;;  %v3824_v42 = vor.u32 %v4216_v3, %v3823_v19  ;;  %v4224_v55 = vld [vmem:[#allocation2 + $0x230] sm:$0xf0] }
 0x170   : > { %v1814_v9 = vrot.slane %v1813_v6, 4 }
 0x172   : > { %v3009_v13 = vpop.f32.mrf.mxu2  ;;  %v1819_v14 = vsel %vm4730_vm2, %v1814_v9, %v1818_v59 }
 0x173   : > { %v3010_v38 = vadd.f32 %v3009_v13, %v2961_v15  ;;  %1851 = vst [vmem:[#allocation2 + $0x23c] sm:$0xf] %v1819_v14 }
 0x174   : > { %v3058_v39 = vpop.f32.mrf.mxu3  ;;  %v2963_v60 = vpop.f32.mrf.mxu1 }
 0x175   : > { %v3059_v63 = vadd.f32 %v3058_v39, %v3010_v38  ;;  %v2964_v4 = vadd.f32 %v2963_v60, %v5088_v7  ;;  %v3845_v60 = vld [vmem:[#allocation2 + $0x22c] sm:$0xf0] }
 0x176   : > { %v3110_v49 = vpop.f32.mrf.mxu0  ;;  %v3859_v43 = vld [vmem:[#allocation2 + $0x218] sm:$0xf] }
 0x177   : > { %3158 = vmatmul.bf16.gmra.mxu1 %v3776_v52  ;;  %3207 = vmatmul.bf16.gmra.mxu2 %v3780_v53  ;;  %v5260_v54 = vadd.f32 %v3107_v17, %v3059_v63  ;;  %v4210_v17 = vld [vmem:[#allocation2 + $0x1c4] sm:$0xf]  ;;  %v3851_v52 = vld [vmem:[#allocation2 + $0x210] sm:$0xf] }
 0x178   : > { %v3812_v33 = vor.u32 %v4210_v17, %v3809_v25  ;;  %v3852_v8 = vor.u32 %v4224_v55, %v3851_v52 }
 0x179   : > { %3256 = vmatmul.bf16.gmra.mxu3 %v3784_v1  ;;  %3305 = vmatmul.bf16.gmra.mxu0 %v3788_v62  ;;  %v4220_v1 = vld [vmem:[#allocation2 + $0x214] sm:$0xf]  ;;  %v3853_v62 = vld [vmem:[#allocation2 + $0x234] sm:$0xf0] }
 0x17a   : > { %v3012_v15 = vpop.f32.mrf.mxu2  ;;  %v4225_v63 = vld [vmem:[#allocation2 + $0x238] sm:$0xf0]  ;;  %v3856_v14 = vor.u32 %v4220_v1, %v3853_v62 }
 0x17b   : > { %v3013_v7 = vadd.f32 %v3012_v15, %v2964_v4  ;;  %v3860_v15 = vor.u32 %v4225_v63, %v3859_v43 }
 0x17c   : > { %v3061_v18 = vpop.f32.mrf.mxu3  ;;  %v2965_v0 = vpop.f32.mrf.mxu1 }
 0x17d   : > { %v3062_v20 = vadd.f32 %v3061_v18, %v3013_v7  ;;  %v2966_v21 = vadd.f32 %v2965_v0, %v5112_v57 }
 0x17e   : > { %v3112_v29 = vpop.f32.mrf.mxu0 }
 0x17f   : > { %v5265_v5 = vadd.f32 %v3110_v49, %v3062_v20 }
 0x182   : > { %v3014_v30 = vpop.f32.mrf.mxu2 }
 0x183   : > { %v3015_v31 = vadd.f32 %v3014_v30, %v2966_v21 }
 0x184   : > { %v3063_v32 = vpop.f32.mrf.mxu3  ;;  %v2968_v41 = vpop.f32.mrf.mxu1 }
 0x185   : > { %v3064_v57 = vadd.f32 %v3063_v32, %v3015_v31  ;;  %v2969_v45 = vadd.f32 %v2968_v41, %v5053_v58  ;;  %v4219_v58 = vld [vmem:[#allocation2 + $0x20c] sm:$0xf] }
 0x186   : > { %v3115_v47 = vpop.f32.mrf.mxu0  ;;  %v3848_v59 = vor.u32 %v4219_v58, %v3845_v60 }
 0x187   : > { %3163 = vmatmul.bf16.gmra.mxu1 %v3812_v33  ;;  %3212 = vmatmul.bf16.gmra.mxu2 %v3816_v40  ;;  %v5268_v46 = vadd.f32 %v3112_v29, %v3064_v57 }
 0x189   : > { %3261 = vmatmul.bf16.gmra.mxu3 %v3820_v24  ;;  %3310 = vmatmul.bf16.gmra.mxu0 %v3824_v42 }
 0x18a   : > { %v3017_v13 = vpop.f32.mrf.mxu2 }
 0x18b   : > { %v3018_v53 = vadd.f32 %v3017_v13, %v2969_v45 }
 0x18c   : > { %v3066_v10 = vpop.f32.mrf.mxu3  ;;  %v2970_v48 = vpop.f32.mrf.mxu1 }
 0x18d   : > { %v3067_v50 = vadd.f32 %v3066_v10, %v3018_v53  ;;  %v2971_v38 = vadd.f32 %v2970_v48, %v5073_v37 }
 0x18e   : > { %v3117_v39 = vpop.f32.mrf.mxu0 }
 0x18f   : > { %v5271_v56 = vadd.f32 %v3115_v47, %v3067_v50 }
 0x192   : > { %v3019_v4 = vpop.f32.mrf.mxu2 }
 0x193   : > { %v3020_v49 = vadd.f32 %v3019_v4, %v2971_v38 }
 0x194   : > { %v3068_v6 = vpop.f32.mrf.mxu3  ;;  %v2973_v9 = vpop.f32.mrf.mxu1 }
 0x195   : > { %v3069_v37 = vadd.f32 %v3068_v6, %v3020_v49  ;;  %v2974_v7 = vadd.f32 %v2973_v9, %v5092_v12 }
 0x196   : > { %v3120_v18 = vpop.f32.mrf.mxu0 }
 0x197   : > { %3168 = vmatmul.bf16.gmra.mxu1 %v3848_v59  ;;  %3217 = vmatmul.bf16.gmra.mxu2 %v3852_v8  ;;  %v5274_v0 = vadd.f32 %v3117_v39, %v3069_v37 }
 0x199   : > { %3266 = vmatmul.bf16.gmra.mxu3 %v3856_v14  ;;  %3315 = vmatmul.bf16.gmra.mxu0 %v3860_v15 }
 0x19a   : > { %v3022_v20 = vpop.f32.mrf.mxu2 }
 0x19b   : > { %v3023_v21 = vadd.f32 %v3022_v20, %v2974_v7 }
 0x19c   : > { %v3071_v29 = vpop.f32.mrf.mxu3  ;;  %v2975_v22 = vpop.f32.mrf.mxu1 }
 0x19d   : > { %v3072_v23 = vadd.f32 %v3071_v29, %v3023_v21  ;;  %v2976_v17 = vadd.f32 %v2975_v22, %v5115_v34 }
 0x19e   : > { %v3122_v25 = vpop.f32.mrf.mxu0 }
 0x19f   : > { %v5277_v27 = vadd.f32 %v3120_v18, %v3072_v23 }
 0x1a2   : > { %v3024_v28 = vpop.f32.mrf.mxu2 }
 0x1a3   : > { %v3025_v12 = vadd.f32 %v3024_v28, %v2976_v17 }
 0x1a4   : > { %v3073_v19 = vpop.f32.mrf.mxu3  ;;  %v3134_v3 = vpop.f32.mrf.mxu1 }
 0x1a5   : > { %v3074_v30 = vadd.f32 %v3073_v19, %v3025_v12  ;;  %v3135_v33 = vadd.f32 %v3134_v3, %v5136_v16 }
 0x1a6   : > { %v3281_v31 = vpop.f32.mrf.mxu0 }
 0x1a7   : > { %v5279_v32 = vadd.f32 %v3122_v25, %v3074_v30 }
 0x1aa   : > { %v3183_v40 = vpop.f32.mrf.mxu2 }
 0x1ab   : > { %v3184_v41 = vadd.f32 %v3183_v40, %v3135_v33 }
 0x1ac   : > { %v3232_v24 = vpop.f32.mrf.mxu3  ;;  %v3136_v42 = vpop.f32.mrf.mxu1 }
 0x1ad   : > { %v3233_v57 = vadd.f32 %v3232_v24, %v3184_v41  ;;  %v3137_v47 = vadd.f32 %v3136_v42, %v5147_v61 }
 0x1ae   : > { %v3283_v34 = vpop.f32.mrf.mxu0 }
 0x1af   : > { %v3282_v45 = vadd.f32 %v3281_v31, %v3233_v57 }
 0x1b1   : > { %3321 = vst [vmem:[%s5283_s8] sm:$0xff] %v3282_v45 }
 0x1b2   : > { %v3185_v13 = vpop.f32.mrf.mxu2 }
 0x1b3   : > { %v3186_v53 = vadd.f32 %v3185_v13, %v3137_v47 }
 0x1b4   : > { %v3234_v10 = vpop.f32.mrf.mxu3  ;;  %v3139_v16 = vpop.f32.mrf.mxu1 }
 0x1b5   : > { %v3235_v48 = vadd.f32 %v3234_v10, %v3186_v53  ;;  %v3140_v39 = vadd.f32 %v3139_v16, %v5166_v51 }
 0x1b6   : > { %v3286_v50 = vpop.f32.mrf.mxu0 }
 0x1b7   : > { %v3284_v38 = vadd.f32 %v3283_v34, %v3235_v48 }
 0x1b9   : > { %3322 = vst [vmem:[%s5283_s8 + $0x8] sm:$0xff] %v3284_v38 }
 0x1ba   : > { %v3188_v52 = vpop.f32.mrf.mxu2 }
 0x1bb   : > { %v3189_v55 = vadd.f32 %v3188_v52, %v3140_v39 }
 0x1bc   : > { %v3237_v58 = vpop.f32.mrf.mxu3  ;;  %v3141_v60 = vpop.f32.mrf.mxu1 }
 0x1bd   : > { %v3238_v1 = vadd.f32 %v3237_v58, %v3189_v55  ;;  %v3142_v61 = vadd.f32 %v3141_v60, %v5178_v35 }
 0x1be   : > { %v3288_v62 = vpop.f32.mrf.mxu0 }
 0x1bf   : > { %v3287_v43 = vadd.f32 %v3286_v50, %v3238_v1 }
 0x1c1   : > { %3323 = vst [vmem:[%s5283_s8 + $0x10] sm:$0xff] %v3287_v43 }
 0x1c2   : > { %v3190_v63 = vpop.f32.mrf.mxu2 }
 0x1c3   : > { %v3191_v4 = vadd.f32 %v3190_v63, %v3142_v61 }
 0x1c4   : > { %v3239_v49 = vpop.f32.mrf.mxu3  ;;  %v3144_v6 = vpop.f32.mrf.mxu1 }
 0x1c5   : > { %v3240_v59 = vadd.f32 %v3239_v49, %v3191_v4  ;;  %v3145_v51 = vadd.f32 %v3144_v6, %v5197_v26 }
 0x1c6   : > { %v3291_v8 = vpop.f32.mrf.mxu0 }
 0x1c7   : > { %v3289_v9 = vadd.f32 %v3288_v62, %v3240_v59 }
 0x1c9   : > { %3324 = vst [vmem:[%s5283_s8 + $0x18] sm:$0xff] %v3289_v9 }
 0x1ca   : > { %v3193_v14 = vpop.f32.mrf.mxu2 }
 0x1cb   : > { %v3194_v15 = vadd.f32 %v3193_v14, %v3145_v51 }
 0x1cc   : > { %v3242_v37 = vpop.f32.mrf.mxu3  ;;  %v3146_v7 = vpop.f32.mrf.mxu1 }
 0x1cd   : > { %v3243_v18 = vadd.f32 %v3242_v37, %v3194_v15  ;;  %v3147_v35 = vadd.f32 %v3146_v7, %v5209_v11 }
 0x1ce   : > { %v3293_v20 = vpop.f32.mrf.mxu0 }
 0x1cf   : > { %v3292_v21 = vadd.f32 %v3291_v8, %v3243_v18 }
 0x1d1   : > { %3325 = vst [vmem:[%s5283_s8 + $0x20] sm:$0xff] %v3292_v21 }
 0x1d2   : > { %v3195_v29 = vpop.f32.mrf.mxu2 }
 0x1d3   : > { %v3196_v22 = vadd.f32 %v3195_v29, %v3147_v35 }
 0x1d4   : > { %v3244_v23 = vpop.f32.mrf.mxu3  ;;  %v3149_v17 = vpop.f32.mrf.mxu1 }
 0x1d5   : > { %v3245_v25 = vadd.f32 %v3244_v23, %v3196_v22  ;;  %v3150_v26 = vadd.f32 %v3149_v17, %v5226_v2 }
 0x1d6   : > { %v3296_v28 = vpop.f32.mrf.mxu0 }
 0x1d7   : > { %v3294_v12 = vadd.f32 %v3293_v20, %v3245_v25 }
 0x1d9   : > { %3326 = vst [vmem:[%s5283_s8 + $0x28] sm:$0xff] %v3294_v12 }
 0x1da   : > { %v3198_v19 = vpop.f32.mrf.mxu2 }
 0x1db   : > { %v3199_v3 = vadd.f32 %v3198_v19, %v3150_v26 }
 0x1dc   : > { %v3247_v30 = vpop.f32.mrf.mxu3  ;;  %v3151_v31 = vpop.f32.mrf.mxu1 }
 0x1dd   : > { %v3248_v33 = vadd.f32 %v3247_v30, %v3199_v3  ;;  %v3152_v11 = vadd.f32 %v3151_v31, %v5236_v44 }
 0x1de   : > { %v3298_v40 = vpop.f32.mrf.mxu0 }
 0x1df   : > { %v3297_v41 = vadd.f32 %v3296_v28, %v3248_v33 }
 0x1e1   : > { %3327 = vst [vmem:[%s5283_s8 + $0x30] sm:$0xff] %v3297_v41 }
 0x1e2   : > { %v3200_v24 = vpop.f32.mrf.mxu2 }
 0x1e3   : > { %v3201_v42 = vadd.f32 %v3200_v24, %v3152_v11 }
 0x1e4   : > { %v3249_v57 = vpop.f32.mrf.mxu3  ;;  %v3154_v34 = vpop.f32.mrf.mxu1 }
 0x1e5   : > { %v3250_v45 = vadd.f32 %v3249_v57, %v3201_v42  ;;  %v3155_v2 = vadd.f32 %v3154_v34, %v5252_v36 }
 0x1e6   : > { %v3301_v47 = vpop.f32.mrf.mxu0 }
 0x1e7   : > { %v3299_v13 = vadd.f32 %v3298_v40, %v3250_v45 }
 0x1e9   : > { %3328 = vst [vmem:[%s5283_s8 + $0x38] sm:$0xff] %v3299_v13 }
 0x1ea   : > { %v3203_v53 = vpop.f32.mrf.mxu2 }
 0x1eb   : > { %v3204_v10 = vadd.f32 %v3203_v53, %v3155_v2 }
 0x1ec   : > { %v3252_v16 = vpop.f32.mrf.mxu3  ;;  %v3156_v48 = vpop.f32.mrf.mxu1 }
 0x1ed   : > { %v3253_v50 = vadd.f32 %v3252_v16, %v3204_v10  ;;  %v3157_v44 = vadd.f32 %v3156_v48, %v5260_v54 }
 0x1ee   : > { %v3303_v38 = vpop.f32.mrf.mxu0 }
 0x1ef   : > { %v3302_v39 = vadd.f32 %v3301_v47, %v3253_v50 }
 0x1f1   : > { %3329 = vst [vmem:[%s5283_s8 + $0x40] sm:$0xff] %v3302_v39 }
 0x1f2   : > { %v3205_v52 = vpop.f32.mrf.mxu2 }
 0x1f3   : > { %v3206_v55 = vadd.f32 %v3205_v52, %v3157_v44 }
 0x1f4   : > { %v3254_v58 = vpop.f32.mrf.mxu3  ;;  %v3159_v60 = vpop.f32.mrf.mxu1 }
 0x1f5   : > { %v3255_v1 = vadd.f32 %v3254_v58, %v3206_v55  ;;  %v3160_v36 = vadd.f32 %v3159_v60, %v5265_v5 }
 0x1f6   : > { %v3306_v62 = vpop.f32.mrf.mxu0 }
 0x1f7   : > { %v3304_v43 = vadd.f32 %v3303_v38, %v3255_v1 }
 0x1f9   : > { %3330 = vst [vmem:[%s5283_s8 + $0x48] sm:$0xff] %v3304_v43 }
 0x1fa   : > { %v3208_v61 = vpop.f32.mrf.mxu2 }
 0x1fb   : > { %v3209_v63 = vadd.f32 %v3208_v61, %v3160_v36 }
 0x1fc   : > { %v3257_v4 = vpop.f32.mrf.mxu3  ;;  %v3161_v49 = vpop.f32.mrf.mxu1 }
 0x1fd   : > { %v3258_v6 = vadd.f32 %v3257_v4, %v3209_v63  ;;  %v3162_v54 = vadd.f32 %v3161_v49, %v5268_v46 }
 0x1fe   : > { %v3308_v59 = vpop.f32.mrf.mxu0 }
 0x1ff   : > { %v3307_v8 = vadd.f32 %v3306_v62, %v3258_v6 }
 0x201   : > { %3331 = vst [vmem:[%s5283_s8 + $0x50] sm:$0xff] %v3307_v8 }
 0x202   : > { %v3210_v9 = vpop.f32.mrf.mxu2 }
 0x203   : > { %v3211_v51 = vadd.f32 %v3210_v9, %v3162_v54 }
 0x204   : > { %v3259_v14 = vpop.f32.mrf.mxu3  ;;  %v3164_v15 = vpop.f32.mrf.mxu1 }
 0x205   : > { %v3260_v37 = vadd.f32 %v3259_v14, %v3211_v51  ;;  %v3165_v5 = vadd.f32 %v3164_v15, %v5271_v56 }
 0x206   : > { %v3311_v18 = vpop.f32.mrf.mxu0 }
 0x207   : > { %v3309_v7 = vadd.f32 %v3308_v59, %v3260_v37 }
 0x209   : > { %3332 = vst [vmem:[%s5283_s8 + $0x58] sm:$0xff] %v3309_v7 }
 0x20a   : > { %v3213_v20 = vpop.f32.mrf.mxu2 }
 0x20b   : > { %v3214_v21 = vadd.f32 %v3213_v20, %v3165_v5 }
 0x20c   : > { %v3262_v35 = vpop.f32.mrf.mxu3  ;;  %v3166_v29 = vpop.f32.mrf.mxu1 }
 0x20d   : > { %v3263_v22 = vadd.f32 %v3262_v35, %v3214_v21  ;;  %v3167_v46 = vadd.f32 %v3166_v29, %v5274_v0 }
 0x20e   : > { %v3313_v17 = vpop.f32.mrf.mxu0 }
 0x20f   : > { %v3312_v23 = vadd.f32 %v3311_v18, %v3263_v22 }
 0x211   : > { %3333 = vst [vmem:[%s5283_s8 + $0x60] sm:$0xff] %v3312_v23 }
 0x212   : > { %v3215_v25 = vpop.f32.mrf.mxu2 }
 0x213   : > { %v3216_v28 = vadd.f32 %v3215_v25, %v3167_v46 }
 0x214   : > { %v3264_v12 = vpop.f32.mrf.mxu3  ;;  %v3169_v26 = vpop.f32.mrf.mxu1 }
 0x215   : > { %v3265_v19 = vadd.f32 %v3264_v12, %v3216_v28  ;;  %v3170_v56 = vadd.f32 %v3169_v26, %v5277_v27 }
 0x216   : > { %v3316_v40 = vpop.f32.mrf.mxu0 }
 0x217   : > { %v3314_v3 = vadd.f32 %v3313_v17, %v3265_v19 }
 0x219   : > { %3334 = vst [vmem:[%s5283_s8 + $0x68] sm:$0xff] %v3314_v3 }
 0x21a   : > { %v3218_v30 = vpop.f32.mrf.mxu2 }
 0x21b   : > { %v3219_v31 = vadd.f32 %v3218_v30, %v3170_v56 }
 0x21c   : > { %v3267_v33 = vpop.f32.mrf.mxu3  ;;  %v3171_v0 = vpop.f32.mrf.mxu1 }
 0x21d   : > { %v3268_v41 = vadd.f32 %v3267_v33, %v3219_v31  ;;  %v3172_v24 = vadd.f32 %v3171_v0, %v5279_v32 }
 0x21e   : > { %v3318_v45 = vpop.f32.mrf.mxu0 }
 0x21f   : > { %v3317_v11 = vadd.f32 %v3316_v40, %v3268_v41 }
 0x221   : > { %3335 = vst [vmem:[%s5283_s8 + $0x70] sm:$0xff] %v3317_v11 }
 0x222   : > { %v3220_v42 = vpop.f32.mrf.mxu2 }
 0x223   : > { %v3221_v27 = vadd.f32 %v3220_v42, %v3172_v24 }
 0x224   : > { %v3269_v57 = vpop.f32.mrf.mxu3 }
 0x225   : > { %v3270_v34 = vadd.f32 %v3269_v57, %v3221_v27 }
 0x227   : > { %v3319_v47 = vadd.f32 %v3318_v45, %v3270_v34 }
 0x229   : > { %3336 = vst [vmem:[%s5283_s8 + $0x78] sm:$0xff] %v3319_v47 }
 0x22a   : > { %4395 = shalt.err (!%p4392_p5)
}
 0x22b   : > { %s4432_s6 = smov 128   ;;  %s4433_s5 = smov 8  }
 0x22c   : > { %4326 = dma.vmem_to_hbm [thread:$0]  (%p4492_p6), %s3351_s20, 2048, %s3353_s24, %s3338_s16, %s4432_s6, %s4432_s6, %s4433_s5  }
 0x22d PF: > { %s3367_s7 = sand.u32 1, %s4418_s12   ;;  %p4329_p7 = pnand %p3423_p9, %p4496_p8 }
 0x22e   : > { %s3368_s10 = scalar_lea.sflag [#allocation5], %s3367_s7 }
 0x22f   : > { %p4330_p10 = pneg %p4329_p7 }
 0x231   : > { %4413 = dma.done.wait (%p4330_p10), %s3368_s10, 2048  }
 0x232   : > { %4415 = vsyncadd (%p4330_p10), %s3368_s10, 4294965248  ;;  %p13_p11 = scmp.ge.s32.totalorder %s4477_s18, 4   ;;  %s5359_s12 = smov %s4422_s13 }
 0x233   : > { %s5360_s13 = smov %s4426_s14  ;;  %s5361_s14 = smov %s4490_s21 }
 0x234   : > { %s5362_s15 = smov %s4477_s18  ;;  %15 = sbr.rel (!%p13_p11) target bundleno = 3 (0x3), region = 118 }
 0x239   :  { %3374 = vsyncpa [#allocation5], 1 }
 0x23a   :  { %3376 = vsyncpa [#allocation5 + $0x1], 1 }

</bundles_post_ra>
